<compile_context>
chip_gen: v5e
topology: v5e:2x2
jax: 0.10.0
libtpu: 0.0.40
codegen_flags: <defaults>
</compile_context>

<pallas_src>
import jax
import jax.numpy as jnp
import numpy as np
from jax.experimental import pallas as pl
from jax.experimental.pallas import tpu as pltpu

UNITS1 = 400       # fc_s1 hidden size (logical, from the PyTorch module)
UNITS2 = 300       # fc_2 hidden size (logical)
UNITS1_PAD = 512   # zero-padded to lane multiples of 128 (results unchanged)
UNITS2_PAD = 384


def _round_up(x, m):
    return (x + m - 1) // m * m


def critic_kernel(state_ref, action_ref,
                  w1_ref, b1_ref,
                  w2s_ref, w2a_ref, b2_ref,
                  w3_ref, b3_ref,
                  out_ref):
    # Activations cast to bf16 in-kernel (tiny VPU op); weights already bf16.
    state = state_ref[...].astype(jnp.bfloat16)
    action = action_ref[...].astype(jnp.bfloat16)

    # layer 1: xs = relu(state @ W1 + b1)   (bf16 MXU operands, f32 accumulation)
    xs = jnp.dot(state, w1_ref[...], preferred_element_type=jnp.float32)
    xs = jnp.maximum(xs + b1_ref[...], 0.0)

    # layer 2: h = relu(cat(xs, action) @ W2 + b2)
    #        == relu(xs @ W2_s + action @ W2_a + b2)       (concat-free split)
    h = jnp.dot(xs.astype(jnp.bfloat16), w2s_ref[...],
                preferred_element_type=jnp.float32)
    h = h + jnp.dot(action, w2a_ref[...], preferred_element_type=jnp.float32)
    h = jnp.maximum(h + b2_ref[...], 0.0)

    # layer 3 (out_features = 1), computed lane-dense:
    #   q8 (8, TB) = w3_pad (8, H2) . h (TB, H2)^T   [contract over H2]
    # w3_pad has the real weights in row 0 and zeros elsewhere, so row 0 of q8
    # is the Q value for every batch row of the tile, already laid out along
    # lanes -> no (TB,1) lane-sparse column, no relayout before the store.
    q8 = jax.lax.dot_general(
        w3_ref[...], h,
        dimension_numbers=(((1,), (1,)), ((), ())),
        preferred_element_type=jnp.float32)            # (8, TB) f32

    # b3 is a scalar living in SMEM; write the lane-major (1, TB) row.
    out_ref[0] = q8[0:1, :] + b3_ref[0, 0]


def critic_forward(state, action, params, *, block_b=4096, target_grid=2):
    """state: (B, state_size) f32, action: (B, action_size) f32 -> (B, 1) f32."""
    w1, b1, w2s, w2a, b2, w3p, b3 = params
    B, state_size = state.shape
    action_size = action.shape[1]
    H1 = w1.shape[1]
    H2 = w2s.shape[1]

    # Batch tile: aim for `target_grid` grid steps (2 lets both v7x TCs work),
    # rounded to 128 rows so the lane-major output tile stays dense, capped by
    # block_b. Footprint ~3.6 KiB of f32 intermediates per batch row, so
    # block_b=4096 is ~15 MiB, inside the explicitly raised scoped-VMEM limit.
    TB = _round_up(pl.cdiv(B, target_grid), 128)
    TB = min(TB, _round_up(block_b, 128))
    B_pad = _round_up(B, TB)
    if B_pad != B:
        state = jnp.pad(state, ((0, B_pad - B), (0, 0)))
        action = jnp.pad(action, ((0, B_pad - B), (0, 0)))
    num_tiles = B_pad // TB

    in_specs = [
        pl.BlockSpec((TB, state_size), lambda i: (i, 0)),            # state tile
        pl.BlockSpec((TB, action_size), lambda i: (i, 0)),           # action tile
        pl.BlockSpec((state_size, H1), lambda i: (0, 0)),            # W1 (resident)
        pl.BlockSpec((1, H1), lambda i: (0, 0)),                     # b1
        pl.BlockSpec((H1, H2), lambda i: (0, 0)),                    # W2_s
        pl.BlockSpec((action_size, H2), lambda i: (0, 0)),           # W2_a
        pl.BlockSpec((1, H2), lambda i: (0, 0)),                     # b2
        pl.BlockSpec((8, H2), lambda i: (0, 0)),                     # W3 (row 0 real)
        pl.BlockSpec((1, 1), lambda i: (0, 0),
                     memory_space=pltpu.MemorySpace.SMEM),           # b3 scalar
    ]
    # Lane-dense output: one (1, 1, TB) lane-major row per batch tile.
    out_specs = pl.BlockSpec((1, 1, TB), lambda i: (i, 0, 0))

    args = (state, action, w1, b1, w2s, w2a, b2, w3p, b3)

    flops = 2 * B_pad * (state_size * H1 + H1 * H2 + action_size * H2 + H2)
    bytes_accessed = sum(int(a.size) * a.dtype.itemsize for a in args) + B_pad * 4
    cost = pl.CostEstimate(flops=flops, transcendentals=0,
                           bytes_accessed=bytes_accessed)

    out = pl.pallas_call(
        critic_kernel,
        out_shape=jax.ShapeDtypeStruct((num_tiles, 1, TB), jnp.float32),
        grid=(num_tiles,),
        in_specs=in_specs,
        out_specs=out_specs,
        compiler_params=pltpu.CompilerParams(
            dimension_semantics=("parallel",),
            vmem_limit_bytes=48 * 1024 * 1024),
        cost_estimate=cost,
    )(*args)

    # (num_tiles, 1, TB) lane-major -> (B_pad, 1); tile-major order == batch order.
    return out.reshape(B_pad, 1)[:B]


def init_params(key, state_size, action_size):
    """Deterministic init mirroring the PyTorch module's shapes / ranges,
    zero-padded to lane-dense hidden sizes (padding does not change results).
    MXU weight operands are stored as bf16 once here (no per-call casts)."""
    ks = jax.random.split(key, 6)

    # fc_s1: Linear(state_size, 400); hidden_init uses weight.size()[0] = out_features
    lim1 = 1.0 / np.sqrt(UNITS1)
    w1 = jax.random.uniform(ks[0], (state_size, UNITS1), jnp.float32, -lim1, lim1)
    b1 = jax.random.uniform(ks[1], (1, UNITS1), jnp.float32,
                            -1.0 / np.sqrt(state_size), 1.0 / np.sqrt(state_size))
    w1 = jnp.pad(w1, ((0, 0), (0, UNITS1_PAD - UNITS1)))
    b1 = jnp.pad(b1, ((0, 0), (0, UNITS1_PAD - UNITS1)))

    # fc_2: Linear(400 + action_size, 300)
    lim2 = 1.0 / np.sqrt(UNITS2)
    w2 = jax.random.uniform(ks[2], (UNITS1 + action_size, UNITS2), jnp.float32,
                            -lim2, lim2)
    b2 = jax.random.uniform(ks[3], (1, UNITS2), jnp.float32,
                            -1.0 / np.sqrt(UNITS1 + action_size),
                            1.0 / np.sqrt(UNITS1 + action_size))
    w2s = jnp.pad(w2[:UNITS1, :], ((0, UNITS1_PAD - UNITS1), (0, UNITS2_PAD - UNITS2)))
    w2a = jnp.pad(w2[UNITS1:, :], ((0, 0), (0, UNITS2_PAD - UNITS2)))
    b2 = jnp.pad(b2, ((0, 0), (0, UNITS2_PAD - UNITS2)))

    # fc_3: Linear(300, 1), weight uniform(-3e-3, 3e-3). Stored as an (8, H2)
    # block with the real row in sublane 0 and zeros elsewhere, so the final
    # layer is a clean 8-row MXU matmul with a lane-dense result.
    w3 = jax.random.uniform(ks[4], (1, UNITS2), jnp.float32, -0.003, 0.003)
    w3p = jnp.zeros((8, UNITS2_PAD), jnp.float32).at[0, :UNITS2].set(w3[0])
    b3 = jax.random.uniform(ks[5], (1, 1), jnp.float32,
                            -1.0 / np.sqrt(UNITS2), 1.0 / np.sqrt(UNITS2))

    return (w1.astype(jnp.bfloat16), b1,
            w2s.astype(jnp.bfloat16), w2a.astype(jnp.bfloat16), b2,
            w3p, b3)


def critic_reference(state, action, params):
    """Plain-JAX (f32) reference reproducing the PyTorch forward."""
    w1, b1, w2s, w2a, b2, w3p, b3 = params
    w1 = w1.astype(jnp.float32)
    w2 = jnp.concatenate([w2s, w2a], axis=0).astype(jnp.float32)
    xs = jax.nn.relu(state @ w1 + b1)
    x = jnp.concatenate([xs, action], axis=1)
    x = jax.nn.relu(x @ w2 + b2)
    return x @ w3p[0:1, :].T + b3


if __name__ == "__main__":
    batch = 200         # not a multiple of the 128-row tile -> exercises padding
    state_size = 8
    action_size = 4

    key = jax.random.PRNGKey(0)
    k_state, k_action, k_params = jax.random.split(key, 3)

    state = jax.random.normal(k_state, (batch, state_size), jnp.float32)
    action = jax.random.normal(k_action, (batch, action_size), jnp.float32)
    params = init_params(k_params, state_size, action_size)

    q = critic_forward(state, action, params)   # TB=128, grid of 2 batch tiles
    q = jax.block_until_ready(q)
    assert q.shape == (batch, 1)

    q_ref = critic_reference(state, action, params)
    # bf16 matmul operands with f32 accumulation -> loosen tolerance slightly.
    np.testing.assert_allclose(np.asarray(q), np.asarray(q_ref),
                               rtol=1e-2, atol=1e-2)

    print("KERNEL_OK")
</pallas_src>

<mosaic_0001>
module attributes {stable_mosaic.version = 11 : i64} {
  func.func @critic_kernel(%arg0: i32, %arg1: memref<128x8xf32, #tpu.memory_space<vmem>>, %arg2: memref<128x4xf32, #tpu.memory_space<vmem>>, %arg3: memref<8x512xbf16, #tpu.memory_space<vmem>>, %arg4: memref<1x512xf32, #tpu.memory_space<vmem>>, %arg5: memref<512x384xbf16, #tpu.memory_space<vmem>>, %arg6: memref<4x384xbf16, #tpu.memory_space<vmem>>, %arg7: memref<1x384xf32, #tpu.memory_space<vmem>>, %arg8: memref<8x384xf32, #tpu.memory_space<vmem>>, %arg9: memref<1x1xf32, #tpu.memory_space<smem>>, %arg10: memref<1x1x128xf32, #tpu.memory_space<vmem>>) attributes {dimension_semantics = [#tpu.dimension_semantics<parallel>], iteration_bounds = array<i64: 2>, scalar_prefetch = 0 : i64, scratch_operands = 0 : i64, tpu.core_type = #tpu.core_type<tc>, window_params = [{transform_indices = @transform_0, window_bounds = array<i64: 128, 8>}, {transform_indices = @transform_1, window_bounds = array<i64: 128, 4>}, {pipeline_mode = #tpu.pipeline_mode<synchronous>, transform_indices = @transform_2, window_bounds = array<i64: 8, 512>}, {pipeline_mode = #tpu.pipeline_mode<synchronous>, transform_indices = @transform_3, window_bounds = array<i64: 1, 512>}, {pipeline_mode = #tpu.pipeline_mode<synchronous>, transform_indices = @transform_4, window_bounds = array<i64: 512, 384>}, {pipeline_mode = #tpu.pipeline_mode<synchronous>, transform_indices = @transform_5, window_bounds = array<i64: 4, 384>}, {pipeline_mode = #tpu.pipeline_mode<synchronous>, transform_indices = @transform_6, window_bounds = array<i64: 1, 384>}, {pipeline_mode = #tpu.pipeline_mode<synchronous>, transform_indices = @transform_7, window_bounds = array<i64: 8, 384>}, {transform_indices = @transform_8, window_bounds = array<i64: 1, 1>}, {transform_indices = @transform_9, window_bounds = array<i64: 1, 1, 128>}]} {
    %c0 = arith.constant 0 : index
    %c0_0 = arith.constant 0 : index
    %0 = vector.load %arg1[%c0, %c0_0] : memref<128x8xf32, #tpu.memory_space<vmem>>, vector<128x8xf32>
    %1 = arith.truncf %0 : vector<128x8xf32> to vector<128x8xbf16>
    %c0_1 = arith.constant 0 : index
    %c0_2 = arith.constant 0 : index
    %2 = vector.load %arg2[%c0_1, %c0_2] : memref<128x4xf32, #tpu.memory_space<vmem>>, vector<128x4xf32>
    %3 = arith.truncf %2 : vector<128x4xf32> to vector<128x4xbf16>
    %c0_3 = arith.constant 0 : index
    %c0_4 = arith.constant 0 : index
    %4 = vector.load %arg3[%c0_3, %c0_4] : memref<8x512xbf16, #tpu.memory_space<vmem>>, vector<8x512xbf16>
    %cst = arith.constant dense<0.000000e+00> : vector<128x512xf32>
    %5 = tpu.matmul %1, %4, %cst {dimension_numbers = #tpu.dot_dimension_numbers<[1], [0], [0], [1], [0, 0, 1, 1], [], []>} : vector<128x8xbf16>, vector<8x512xbf16>, vector<128x512xf32> -> vector<128x512xf32>
    %c0_5 = arith.constant 0 : index
    %c0_6 = arith.constant 0 : index
    %6 = vector.load %arg4[%c0_5, %c0_6] : memref<1x512xf32, #tpu.memory_space<vmem>>, vector<1x512xf32>
    %7 = vector.broadcast %6 : vector<1x512xf32> to vector<128x512xf32>
    %8 = arith.addf %5, %7 : vector<128x512xf32>
    %cst_7 = arith.constant 0.000000e+00 : f32
    %9 = vector.broadcast %cst_7 : f32 to vector<128x512xf32>
    %10 = arith.maximumf %8, %9 : vector<128x512xf32>
    %11 = arith.truncf %10 : vector<128x512xf32> to vector<128x512xbf16>
    %c0_8 = arith.constant 0 : index
    %c0_9 = arith.constant 0 : index
    %12 = vector.load %arg5[%c0_8, %c0_9] : memref<512x384xbf16, #tpu.memory_space<vmem>>, vector<512x384xbf16>
    %cst_10 = arith.constant dense<0.000000e+00> : vector<128x384xf32>
    %13 = tpu.matmul %11, %12, %cst_10 {dimension_numbers = #tpu.dot_dimension_numbers<[1], [0], [0], [1], [0, 0, 1, 1], [], []>} : vector<128x512xbf16>, vector<512x384xbf16>, vector<128x384xf32> -> vector<128x384xf32>
    %c0_11 = arith.constant 0 : index
    %c0_12 = arith.constant 0 : index
    %14 = vector.load %arg6[%c0_11, %c0_12] : memref<4x384xbf16, #tpu.memory_space<vmem>>, vector<4x384xbf16>
    %cst_13 = arith.constant dense<0.000000e+00> : vector<128x384xf32>
    %15 = tpu.matmul %3, %14, %cst_13 {dimension_numbers = #tpu.dot_dimension_numbers<[1], [0], [0], [1], [0, 0, 1, 1], [], []>} : vector<128x4xbf16>, vector<4x384xbf16>, vector<128x384xf32> -> vector<128x384xf32>
    %16 = arith.addf %13, %15 : vector<128x384xf32>
    %c0_14 = arith.constant 0 : index
    %c0_15 = arith.constant 0 : index
    %17 = vector.load %arg7[%c0_14, %c0_15] : memref<1x384xf32, #tpu.memory_space<vmem>>, vector<1x384xf32>
    %18 = vector.broadcast %17 : vector<1x384xf32> to vector<128x384xf32>
    %19 = arith.addf %16, %18 : vector<128x384xf32>
    %cst_16 = arith.constant 0.000000e+00 : f32
    %20 = vector.broadcast %cst_16 : f32 to vector<128x384xf32>
    %21 = arith.maximumf %19, %20 : vector<128x384xf32>
    %c0_17 = arith.constant 0 : index
    %c0_18 = arith.constant 0 : index
    %22 = vector.load %arg8[%c0_17, %c0_18] : memref<8x384xf32, #tpu.memory_space<vmem>>, vector<8x384xf32>
    %cst_19 = arith.constant dense<0.000000e+00> : vector<8x128xf32>
    %23 = tpu.matmul %22, %21, %cst_19 {dimension_numbers = #tpu.dot_dimension_numbers<[1], [1], [0], [0], [0, 0, 1, 0], [], []>} : vector<8x384xf32>, vector<128x384xf32>, vector<8x128xf32> -> vector<8x128xf32>
    %24 = vector.extract_strided_slice %23 {offsets = [0, 0], sizes = [1, 128], strides = [1, 1]} : vector<8x128xf32> to vector<1x128xf32>
    %c0_20 = arith.constant 0 : index
    %c0_21 = arith.constant 0 : index
    %25 = memref.load %arg9[%c0_20, %c0_21] : memref<1x1xf32, #tpu.memory_space<smem>>
    %26 = vector.broadcast %25 : f32 to vector<1x128xf32>
    %27 = arith.addf %24, %26 : vector<1x128xf32>
    %c0_22 = arith.constant 0 : index
    %c0_23 = arith.constant 0 : index
    %c0_24 = arith.constant 0 : index
    %28 = vector.load %arg10[%c0_22, %c0_23, %c0_24] : memref<1x1x128xf32, #tpu.memory_space<vmem>>, vector<1x1x128xf32>
    %29 = vector.shape_cast %28 : vector<1x1x128xf32> to vector<1x128xf32>
    %30 = vector.shape_cast %27 : vector<1x128xf32> to vector<1x1x128xf32>
    tpu.vector_store %arg10[%c0_22, %c0_23, %c0_24], %30 {strides = array<i32>} : memref<1x1x128xf32, #tpu.memory_space<vmem>>, vector<1x1x128xf32>,
    return
  }
  func.func @transform_0(%arg0: i32) -> (i32, i32) {
    %c0_i32 = arith.constant 0 : i32
    %c0_i32_0 = arith.constant 0 : i32
    return %arg0, %c0_i32 : i32, i32
  }
  func.func @transform_1(%arg0: i32) -> (i32, i32) {
    %c0_i32 = arith.constant 0 : i32
    %c0_i32_0 = arith.constant 0 : i32
    return %arg0, %c0_i32 : i32, i32
  }
  func.func @transform_2(%arg0: i32) -> (i32, i32) {
    %c0_i32 = arith.constant 0 : i32
    %c0_i32_0 = arith.constant 0 : i32
    %c0_i32_1 = arith.constant 0 : i32
    return %c0_i32, %c0_i32_0 : i32, i32
  }
  func.func @transform_3(%arg0: i32) -> (i32, i32) {
    %c0_i32 = arith.constant 0 : i32
    %c0_i32_0 = arith.constant 0 : i32
    %c0_i32_1 = arith.constant 0 : i32
    return %c0_i32, %c0_i32_0 : i32, i32
  }
  func.func @transform_4(%arg0: i32) -> (i32, i32) {
    %c0_i32 = arith.constant 0 : i32
    %c0_i32_0 = arith.constant 0 : i32
    %c0_i32_1 = arith.constant 0 : i32
    return %c0_i32, %c0_i32_0 : i32, i32
  }
  func.func @transform_5(%arg0: i32) -> (i32, i32) {
    %c0_i32 = arith.constant 0 : i32
    %c0_i32_0 = arith.constant 0 : i32
    %c0_i32_1 = arith.constant 0 : i32
    return %c0_i32, %c0_i32_0 : i32, i32
  }
  func.func @transform_6(%arg0: i32) -> (i32, i32) {
    %c0_i32 = arith.constant 0 : i32
    %c0_i32_0 = arith.constant 0 : i32
    %c0_i32_1 = arith.constant 0 : i32
    return %c0_i32, %c0_i32_0 : i32, i32
  }
  func.func @transform_7(%arg0: i32) -> (i32, i32) {
    %c0_i32 = arith.constant 0 : i32
    %c0_i32_0 = arith.constant 0 : i32
    %c0_i32_1 = arith.constant 0 : i32
    return %c0_i32, %c0_i32_0 : i32, i32
  }
  func.func @transform_8(%arg0: i32) -> (i32, i32) {
    %c0_i32 = arith.constant 0 : i32
    %c0_i32_0 = arith.constant 0 : i32
    %c0_i32_1 = arith.constant 0 : i32
    return %c0_i32, %c0_i32_0 : i32, i32
  }
  func.func @transform_9(%arg0: i32) -> (i32, i32, i32) {
    %c0_i32 = arith.constant 0 : i32
    %c0_i32_0 = arith.constant 0 : i32
    %c0_i32_1 = arith.constant 0 : i32
    return %arg0, %c0_i32, %c0_i32_0 : i32, i32, i32
  }
}

</mosaic_0001>

<bundles_post_ra>
// kernel: tpu_custom_call.1
= control target key start
LH: loop header
LB: loop body
LE: loop exit
PB: predicated region body
PF: predicated region fallthrough
CT: control target
= control target key end

     0   :  { %s4155_s0 = inlined_call_operand.vmem [shape: f32[256,8], index: 0, kind: input, shape index: {}]   ;;  %s4156_s1 = inlined_call_operand.vmem [shape: f32[256,4], index: 1, kind: input, shape index: {}]   ;;  %s4157_s2 = inlined_call_operand.vmem [shape: bf16[8,512], index: 2, kind: input, shape index: {}]   ;;  %s4158_s3 = inlined_call_operand.vmem [shape: f32[1,512], index: 3, kind: input, shape index: {}]   ;;  %s4159_s4 = inlined_call_operand.hbm [shape: bf16[512,384], index: 4, kind: input, shape index: {}]   ;;  %s4160_s5 = inlined_call_operand.vmem [shape: bf16[4,384], index: 5, kind: input, shape index: {}]   ;;  %s4161_s6 = inlined_call_operand.vmem [shape: f32[1,384], index: 6, kind: input, shape index: {}]   ;;  %s4162_s7 = inlined_call_operand.vmem [shape: f32[8,384], index: 7, kind: input, shape index: {}]   ;;  %s4163_s8 = inlined_call_operand.<no memory space> [shape: f32[1,1], index: 8, kind: input, shape index: {}]   ;;  %s4164_s9 = inlined_call_operand.hbm [shape: f32[2,1,128], index: 9, kind: output, shape index: {}]  }
   0x1   :  { %14 = sst [smem:[#allocation2]] %s4163_s8 }
   0x2   :  { %15 = vsyncpa [#allocation4], 0 }
   0x3   :  { %16 = vsyncpa [#allocation5], 0 }
   0x4   :  { %18 = vsyncpa [#allocation5 + $0x1], 0  ;;  %s3204_s11 = smov 0   ;;  %s3206_s12 = smov 0  }
   0x5   :  { %s3208_s13 = smov 0   ;;  %s3210_s14 = smov 0  }
   0x6 LB: > { %s3225_s8 = sadd.s32 4294967295, %s3146_s14   ;;  %s2449_s15 = sadd.s32 4294967294, %s3146_s14   ;;  %s3146_s14 = sphi %s3210_s14, %s4279_s14   ;;  %s3142_s13 = sphi %s3208_s13, %s4278_s13   ;;  %s3138_s12 = sphi %s3206_s12, %s4277_s12   ;;  %s3134_s11 = sphi %s3204_s11, %s4276_s11  }
   0x7   : > { %s3229_s16 = sadd.s32 1, %s3146_s14   ;;  %s230_s17 = sadd.s32 1, %s3142_s13 }
   0x8   : > { %s227_s18 = ssub.s32 %s3146_s14, %s3229_s16  ;;  %p240_p0 = scmp.ne.s32.totalorder %s3142_s13, %s3138_s12 }
   0x9   : > { %p228_p1 = scmp.eq.s32.totalorder %s227_s18, 0  ;;  %p241_p2 = scmp.eq.s32.totalorder %s3225_s8, 1 }
   0xa   : > { %p246_p3 = scmp.ne.s32.totalorder %s3138_s12, %s3134_s11  ;;  %p247_p4 = scmp.eq.s32.totalorder %s2449_s15, 1 }
   0xb   : > { %s3240_s19 = scalar_select %p228_p1, %s3142_s13, %s230_s17  }
   0xc   : > { %p3242_p5 = por %p241_p2, %p240_p0  ;;  %p3246_p6 = por %p247_p4, %p246_p3 }
   0xd   : > { %p2450_p7 = scmp.ge.s32.totalorder %s3146_s14, 1  ;;  %p254_p8 = scmp.lt.s32.totalorder %s3146_s14, 3 }
   0xe   : > { %p3012_p9 = scmp.eq.s32.totalorder %s3225_s8, 0  ;;  %s271_s24 = sshll.u32 %s4159_s4, 4  ;;  %s272_s24 = int_to_ptr.hbm [resolvable:$true] %s271_s24 }
   0xf   : > { %p255_p10 = pnand %p2450_p7, %p254_p8  ;;  %s3148_s25 = smov [#allocation3]  }
  0x10   : > { %s273_s26 = sshll.u32 %s3148_s25, 4  ;;  %s3149_s27 = smov 192   ;;  %s274_s26 = int_to_ptr.vmem [resolvable:$true] %s273_s26 }
  0x11   : > { %p3004_p11 = pneg %p255_p10  ;;  %s3150_s28 = smov 12  }
  0x12   : > { %319 = sbr.rel (%p255_p10) target bundleno = 1001 (0x3e9), region = 56 }
  0x13   : > { %p3005_p12 = pnand %p3012_p9, %p3004_p11 }
  0x15   : > { %3007 = dma.hbm_to_vmem [thread:$0]  (!%p3005_p12), %s272_s24, 12288, %s274_s26, [#allocation4], %s3149_s27, %s3149_s27, %s3150_s28  }
  0x17   : > { %3125 = dma.done.wait (%p3012_p9), [#allocation4], 12288  }
  0x18   : > { %3127 = vsyncadd (%p3012_p9), [#allocation4], 4294955008  ;;  %s2455_s29 = sshll.u32 %s3225_s8, 4  ;;  %v421_v0 = vld [vmem:[%s4157_s2] sm:$0xff]  ;;  %v422_v1 = vld [vmem:[%s4157_s2 + $0x8] sm:$0xff]  ;;  %vm468_vm0 = vcmask 1043456  }
  0x19   : > { %p361_p13 = scmp.lt.s32.totalorder %s2455_s29, 31  ;;  %v435_v3 = vunpack.c.l.b16 %v421_v0  ;;  %v436_v4 = vunpack.c.h.b16 %v421_v0  ;;  %v437_v5 = vunpack.c.l.b16 %v422_v1  ;;  %v438_v9 = vunpack.c.h.b16 %v422_v1  ;;  %v901_v26 = vld [vmem:[%s4160_s5] sm:$0x3f]  ;;  %v2601_v42 = vld [vmem:[#allocation3 + $0xa8] sm:$0xf]  ;;  %s2353_s27 = sld [smem:[#allocation2]] }
  0x1a   : > { %vm443_vm1 = vcmask 64512   ;;  %903 = vst [vmem:[#allocation1] ss:$4 sm:$0xff] %v901_v26  ;;  %vm932_vm2 = vcmask 1041408   ;;  %v2923_v43 = vld [vmem:[#allocation3 + $0xb0] sm:$0xf0] }
  0x1b   : > { %s4281_s29 = smov (!%p361_p13, %s2455_s29), 31  ;;  %v439_v10 = vpack.c.b16 %v435_v3, %v435_v3  ;;  %v440_v11 = vpack.c.b16 %v436_v4, %v436_v4  ;;  %v441_v12 = vpack.c.b16 %v437_v5, %v437_v5  ;;  %v442_v13 = vpack.c.b16 %v438_v9, %v438_v9  ;;  %v2589_v45 = vld [vmem:[#allocation3 + $0x90] sm:$0xf]  ;;  %v2920_v46 = vld [vmem:[#allocation3 + $0x98] sm:$0xf0]  ;;  %s358_s28 = sand.u32 1, %s3138_s12  }
  0x1c   : > { %s2456_s30 = sshll.u32 %s4281_s29, 3  ;;  %v2602_v44 = vor.u32 %v2923_v43, %v2601_v42  ;;  %v2590_v47 = vor.u32 %v2920_v46, %v2589_v45  ;;  %v2577_v48 = vld [vmem:[#allocation3 + $0x78] sm:$0xf]  ;;  %v2917_v49 = vld [vmem:[#allocation3 + $0x80] sm:$0xf0]  ;;  %vm907_vm3 = vcmask 31744  }
  0x1d   : > { %s3271_s17 = scalar_lea.vmem %s4155_s0, %s2456_s30  ;;  %v470_v16 = vsel %vm468_vm0, %v439_v10, 0  ;;  %v473_v17 = vsel %vm468_vm0, %v440_v11, 0  ;;  %v476_v18 = vsel %vm468_vm0, %v441_v12, 0  ;;  %v479_v19 = vsel %vm468_vm0, %v442_v13, 0  ;;  %v2565_v53 = vld [vmem:[#allocation3 + $0x60] sm:$0xf]  ;;  %s3334_s10 = scalar_lea.vmem %s4156_s1, %s2456_s30 }
  0x1e   : > { %v373_v2 = vld [vmem:[%s3271_s17] sm:$0xff]  ;;  %v374_v6 = vld [vmem:[%s3271_s17 + $0x8] sm:$0xff]  ;;  %v387_v7 = vld [vmem:[%s3271_s17 + $0x70] sm:$0xff]  ;;  %488 = vmatpush.bf16.msra.mxu0 %v470_v16  ;;  %2997 = vmatpush.bf16.msra.mxu3 %v470_v16  ;;  %v2578_v50 = vor.u32 %v2917_v49, %v2577_v48  ;;  %s2366_s30 = scalar_lea.hbm %s4164_s9, %s3225_s8  ;;  %s359_s15 = scalar_lea.vmem [#allocation6], %s358_s28 }
  0x1f   : > { %v388_v8 = vld [vmem:[%s3271_s17 + $0x78] sm:$0xff]  ;;  %v389_v14 = vpack.c.bf16 %v374_v6, %v373_v2  ;;  %537 = vmatpush.bf16.msra.mxu1 %v473_v17  ;;  %586 = vmatpush.bf16.msra.mxu2 %v476_v18  ;;  %v375_v20 = vld [vmem:[%s3271_s17 + $0x10] sm:$0xff]  ;;  %v377_v23 = vld [vmem:[%s3271_s17 + $0x20] sm:$0xff]  ;;  %s2370_s18 = sshll.u32 %s2366_s30, 4  ;;  %s2358_s22 = scalar_lea.sflag [#allocation5], %s358_s28  ;;  %s2371_s18 = int_to_ptr.hbm [resolvable:$true] %s2370_s18 }
  0x20   : > { %v3283_v15 = vpack.c.bf16 %v388_v8, %v387_v7  ;;  %v376_v21 = vld [vmem:[%s3271_s17 + $0x18] sm:$0xff]  ;;  %v378_v24 = vld [vmem:[%s3271_s17 + $0x28] sm:$0xff]  ;;  %v379_v27 = vld [vmem:[%s3271_s17 + $0x30] sm:$0xff]  ;;  %s3094_s23 = sshra.s32 %s2371_s18, 4  ;;  %s3100_s26 = scalar_lea.hbm %s4164_s9, 2  ;;  %s3095_s23 = int_to_ptr.hbm [resolvable:$true] %s3094_s23 }
  0x21   : > { %2459 = vmatmul.msk.bf16.vlgmr.msra.gmra.mxu0 %vm443_vm1, %v389_v14  ;;  %v390_v22 = vpack.c.bf16 %v376_v21, %v375_v20  ;;  %v391_v25 = vpack.c.bf16 %v378_v24, %v377_v23  ;;  %v380_v28 = vld [vmem:[%s3271_s17 + $0x38] sm:$0xff]  ;;  %v906_v29 = vld.sshfl [vmem:[#allocation1 + $0x10] sm:$0xff pattern:$0x73625140]  ;;  %v381_v36 = vld [vmem:[%s3271_s17 + $0x40] sm:$0xff]  ;;  %s3096_s24 = scalar_lea.hbm %s3095_s23, 1  ;;  %p3101_p3 = scmp.lt.s32.totalorder %s3095_s23, %s4164_s9 }
  0x22   : > { %635 = vmatpush.bf16.msrb.mxu3 %v479_v19  ;;  %2467 = vmatmul.msk.bf16.vlgmr.msra.gmra.mxu1 %vm443_vm1, %v389_v14  ;;  %v905_v30 = vld.sshfl [vmem:[#allocation1 + $0x8] sm:$0xff pattern:$0x73625140]  ;;  %v937_v31 = vsel %vm932_vm2, %v906_v29, 0  ;;  %v392_v33 = vpack.c.bf16 %v380_v28, %v379_v27  ;;  %v383_v39 = vld [vmem:[%s3271_s17 + $0x50] sm:$0xff]  ;;  %v384_v40 = vld [vmem:[%s3271_s17 + $0x58] sm:$0xff]  ;;  %p3097_p0 = scmp.ne.s32.totalorder %s3095_s23, %s3096_s24  ;;  %p3102_p4 = scmp.lt.s32.totalorder %s3100_s26, %s3096_s24 }
  0x23   : > { %2466 = vmatmul.msk.bf16.vlgmr.msra.gmra.mxu3 %vm443_vm1, %v3283_v15  ;;  %2475 = vmatmul.msk.bf16.vlgmr.msra.gmra.mxu2 %vm443_vm1, %v389_v14  ;;  %v935_v32 = vsel %vm932_vm2, %v905_v30, 0  ;;  %v904_v34 = vld.sshfl [vmem:[#allocation1] sm:$0xff pattern:$0x73625140]  ;;  %v382_v37 = vld [vmem:[%s3271_s17 + $0x48] sm:$0xff]  ;;  %v394_v41 = vpack.c.bf16 %v384_v40, %v383_v39  ;;  %v399_v8 = vld [vmem:[%s3334_s10 + $0x10] sm:$0xff] }
  0x24   : > { %1044 = vmatpush.bf16.msrb.mxu2 %v937_v31  ;;  %995 = vmatpush.bf16.msrb.mxu1 %v935_v32  ;;  %v933_v35 = vsel %vm932_vm2, %v904_v34, 0  ;;  %v393_v38 = vpack.c.bf16 %v382_v37, %v381_v36  ;;  %v385_v51 = vld [vmem:[%s3271_s17 + $0x60] sm:$0xff]  ;;  %v386_v52 = vld [vmem:[%s3271_s17 + $0x68] sm:$0xff]  ;;  %v2914_v54 = vld [vmem:[#allocation3 + $0x68] sm:$0xf0]  ;;  %s2368_s17 = sshll.u32 %s359_s15, 4  ;;  %p3098_p1 = pnand %p3097_p0, %p3242_p5  ;;  %s2369_s17 = int_to_ptr.vmem [resolvable:$true] %s2368_s17 }
  0x25   : > { %946 = vmatpush.bf16.msrb.mxu0 %v933_v35  ;;  %v395_v55 = vpack.c.bf16 %v386_v52, %v385_v51  ;;  %v2566_v56 = vor.u32 %v2914_v54, %v2565_v53  ;;  %v2553_v57 = vld [vmem:[#allocation3 + $0x48] sm:$0xf]  ;;  %v2911_v58 = vld [vmem:[#allocation3 + $0x50] sm:$0xf0]  ;;  %v2541_v60 = vld [vmem:[#allocation3 + $0x30] sm:$0xf]  ;;  %p3103_p7 = por %p3102_p4, %p3101_p3 }
  0x26   : > { %1598 = vmatpush.bf16.msra.mxu3 %v2602_v44  ;;  %v2554_v59 = vor.u32 %v2911_v58, %v2553_v57  ;;  %v2908_v61 = vld [vmem:[#allocation3 + $0x38] sm:$0xf0]  ;;  %v2529_v63 = vld [vmem:[#allocation3 + $0x18] sm:$0xf]  ;;  %v2905_v0 = vld [vmem:[#allocation3 + $0x20] sm:$0xf0]  ;;  %p3099_p2 = pneg %p3098_p1 }
  0x27   : > { %v2542_v62 = vor.u32 %v2908_v61, %v2541_v60  ;;  %v2530_v1 = vor.u32 %v2905_v0, %v2529_v63  ;;  %v397_v2 = vld [vmem:[%s3334_s10] sm:$0xff]  ;;  %v398_v3 = vld [vmem:[%s3334_s10 + $0x8] sm:$0xff]  ;;  %v2902_v5 = vld [vmem:[#allocation3 + $0x8] sm:$0xf0] }
  0x28   : > { %v2517_v4 = vld [vmem:[#allocation3] sm:$0xf]  ;;  %v413_v6 = vpack.c.bf16 %v398_v3, %v397_v2  ;;  %v400_v9 = vld [vmem:[%s3334_s10 + $0x18] sm:$0xff]  ;;  %v3349_v12 = vld [vmem:[%s4158_s3] sm:$0xf]  ;;  %p3104_p8 = pnand %p3103_p7, %p3099_p2 }
  0x29   : > { %v2518_v7 = vor.u32 %v2902_v5, %v2517_v4  ;;  %v414_v10 = vpack.c.bf16 %v400_v9, %v399_v8  ;;  %v3358_v16 = vperm.slane %v3349_v12, 1  ;;  %v3368_v23 = vperm.slane %v3349_v12, 2  ;;  %v401_v29 = vld [vmem:[%s3334_s10 + $0x20] sm:$0xff]  ;;  %v402_v30 = vld [vmem:[%s3334_s10 + $0x28] sm:$0xff]  ;;  %v2889_v4 = vld [vmem:[#allocation3 + $0x2e8] sm:$0xf] }
  0x2a   : > { %1599 = vmatpush.bf16.msra.mxu3 %v2590_v47  ;;  %v415_v36 = vpack.c.bf16 %v402_v30, %v401_v29  ;;  %v2995_v5 = vld [vmem:[#allocation3 + $0x2f0] sm:$0xf0]  ;;  %v2793_v30 = vld [vmem:[#allocation3 + $0x228] sm:$0xf] }
  0x2e   : > { %1600 = vmatpush.bf16.msra.mxu3 %v2578_v50 }
  0x31   : > { %2460 = vmatmul.msk.bf16.gmra.mxu0 %vm443_vm1, %v390_v22 }
  0x32   : > { %2468 = vmatmul.msk.bf16.gmra.mxu1 %vm443_vm1, %v390_v22  ;;  %1601 = vmatpush.bf16.msra.mxu3 %v2566_v56  ;;  %v404_v56 = vld [vmem:[%s3334_s10 + $0x38] sm:$0xff] }
  0x33   : > { %2483 = vmatmul.msk.bf16.vlgmr.msrb.gmra.mxu3 %vm443_vm1, %v389_v14  ;;  %2476 = vmatmul.msk.bf16.gmra.mxu2 %vm443_vm1, %v390_v22  ;;  %v3352_v14 = vperm.slane %v3349_v12, 0 }
  0x36   : > { %1602 = vmatpush.bf16.msra.mxu3 %v2554_v59 }
  0x3a   : > { %1603 = vmatpush.bf16.msra.mxu3 %v2542_v62 }
  0x3e   : > { %1604 = vmatpush.bf16.msra.mxu3 %v2530_v1 }
  0x41   : > { %2461 = vmatmul.msk.bf16.gmra.mxu0 %vm443_vm1, %v391_v25 }
  0x42   : > { %2469 = vmatmul.msk.bf16.gmra.mxu1 %vm443_vm1, %v391_v25  ;;  %1605 = vmatpush.bf16.msra.mxu3 %v2518_v7  ;;  %v2890_v7 = vor.u32 %v2995_v5, %v2889_v4  ;;  %v2941_v4 = vld [vmem:[#allocation3 + $0x140] sm:$0xf0] }
  0x43   : > { %2484 = vmatmul.msk.bf16.gmra.mxu3 %vm443_vm1, %v390_v22  ;;  %2477 = vmatmul.msk.bf16.gmra.mxu2 %vm443_vm1, %v391_v25 }
  0x44   : > { %1745 = vmatpush.bf16.msra.mxu2 %v2890_v7 }
  0x51   : > { %2462 = vmatmul.msk.bf16.gmra.mxu0 %vm443_vm1, %v392_v33 }
  0x52   : > { %2470 = vmatmul.msk.bf16.gmra.mxu1 %vm443_vm1, %v392_v33 }
  0x53   : > { %2485 = vmatmul.msk.bf16.gmra.mxu3 %vm443_vm1, %v391_v25  ;;  %2478 = vmatmul.msk.bf16.gmra.mxu2 %vm443_vm1, %v392_v33 }
  0x61   : > { %2463 = vmatmul.msk.bf16.gmra.mxu0 %vm443_vm1, %v393_v38 }
  0x62   : > { %2471 = vmatmul.msk.bf16.gmra.mxu1 %vm443_vm1, %v393_v38 }
  0x63   : > { %2486 = vmatmul.msk.bf16.gmra.mxu3 %vm443_vm1, %v392_v33  ;;  %2479 = vmatmul.msk.bf16.gmra.mxu2 %vm443_vm1, %v393_v38 }
  0x71   : > { %2464 = vmatmul.msk.bf16.gmra.mxu0 %vm443_vm1, %v394_v41 }
  0x72   : > { %2472 = vmatmul.msk.bf16.gmra.mxu1 %vm443_vm1, %v394_v41 }
  0x73   : > { %2487 = vmatmul.msk.bf16.gmra.mxu3 %vm443_vm1, %v393_v38  ;;  %2480 = vmatmul.msk.bf16.gmra.mxu2 %vm443_vm1, %v394_v41 }
  0x81   : > { %2465 = vmatmul.msk.bf16.gmra.mxu0 %vm443_vm1, %v395_v55 }
  0x82   : > { %2473 = vmatmul.msk.bf16.gmra.mxu1 %vm443_vm1, %v395_v55 }
  0x83   : > { %2488 = vmatmul.msk.bf16.gmra.mxu3 %vm443_vm1, %v394_v41  ;;  %2481 = vmatmul.msk.bf16.gmra.mxu2 %vm443_vm1, %v395_v55 }
  0x91   : > { %2491 = vmatmul.msk.bf16.vlgmr.msrb.gmra.mxu0 %vm907_vm3, %v413_v6 }
  0x92   : > { %2474 = vmatmul.msk.bf16.gmra.mxu1 %vm443_vm1, %v3283_v15 }
  0x93   : > { %2489 = vmatmul.msk.bf16.gmra.mxu3 %vm443_vm1, %v395_v55  ;;  %2482 = vmatmul.msk.bf16.gmra.mxu2 %vm443_vm1, %v3283_v15  ;;  %v403_v55 = vld [vmem:[%s3334_s10 + $0x30] sm:$0xff] }
  0x94   : > { %v416_v61 = vpack.c.bf16 %v404_v56, %v403_v55  ;;  %v2944_v55 = vld [vmem:[#allocation3 + $0x158] sm:$0xf0] }
  0x9e   : > { %v490_v11 = vpop.f32.mrf.mxu0 }
  0x9f   : > { %v539_v13 = vpop.f32.mrf.mxu1  ;;  %v491_v18 = vadd.f32 %v490_v11, %v3352_v14 }
  0xa0   : > { %v540_v20 = vadd.f32 %v539_v13, %v3358_v16 }
  0xa1   : > { %2492 = vmatmul.msk.bf16.gmra.mxu0 %vm907_vm3, %v414_v10  ;;  %v677_v25 = vmax.f32 %v491_v18, 0.0 }
  0xa2   : > { %2499 = vmatmul.msk.bf16.vlgmr.msrb.gmra.mxu1 %vm907_vm3, %v413_v6  ;;  %v678_v27 = vmax.f32 %v540_v20, 0.0 }
  0xa3   : > { %2490 = vmatmul.msk.bf16.gmra.mxu3 %vm443_vm1, %v3283_v15  ;;  %2507 = vmatmul.msk.bf16.vlgmr.msrb.gmra.mxu2 %vm907_vm3, %v413_v6 }
  0xa6   : > { %v3362_v17 = vpop.f32.mrf.mxu3  ;;  %v588_v19 = vpop.f32.mrf.mxu2 }
  0xa7   : > { %v492_v21 = vpop.f32.mrf.mxu0  ;;  %v541_v22 = vpop.f32.mrf.mxu1  ;;  %v589_v31 = vadd.f32 %v588_v19, %v3368_v23 }
  0xa8   : > { %v493_v15 = vadd.f32 %v492_v21, %v3352_v14  ;;  %v542_v24 = vadd.f32 %v541_v22, %v3358_v16  ;;  %v2697_v21 = vld [vmem:[#allocation3 + $0x168] sm:$0xf] }
  0xa9   : > { %v679_v40 = vmax.f32 %v589_v31, 0.0  ;;  %v2971_v31 = vld [vmem:[#allocation3 + $0x230] sm:$0xf0] }
  0xaa   : > { %v681_v26 = vmax.f32 %v493_v15, 0.0  ;;  %v682_v28 = vmax.f32 %v542_v24, 0.0  ;;  %v2947_v15 = vld [vmem:[#allocation3 + $0x170] sm:$0xf0] }
  0xac   : > { %v3374_v32 = vpack.c.bf16 %v682_v28, %v678_v27  ;;  %v3378_v34 = vpack.c.bf16 %v681_v26, %v677_v25  ;;  %v405_v25 = vld [vmem:[%s3334_s10 + $0x40] sm:$0xff]  ;;  %v406_v26 = vld [vmem:[%s3334_s10 + $0x48] sm:$0xff]  ;;  %v2698_v27 = vor.u32 %v2947_v15, %v2697_v21 }
  0xae   : > { %v3376_v33 = vpop.f32.mrf.mxu3  ;;  %v590_v35 = vpop.f32.mrf.mxu2  ;;  %1647 = vmatpush.bf16.msra.mxu0 %v2698_v27 }
  0xaf   : > { %v591_v37 = vadd.f32 %v590_v35, %v3368_v23  ;;  %v495_v38 = vpop.f32.mrf.mxu0  ;;  %v544_v39 = vpop.f32.mrf.mxu1  ;;  %v2794_v35 = vor.u32 %v2971_v31, %v2793_v30 }
  0xb0   : > { %v496_v44 = vadd.f32 %v495_v38, %v3352_v14  ;;  %v545_v46 = vadd.f32 %v544_v39, %v3358_v16 }
  0xb1   : > { %v683_v41 = vmax.f32 %v591_v37, 0.0  ;;  %2493 = vmatmul.msk.bf16.gmra.mxu0 %vm907_vm3, %v415_v36  ;;  %1696 = vmatpush.bf16.msra.mxu1 %v2794_v35 }
  0xb2   : > { %2500 = vmatmul.msk.bf16.gmra.mxu1 %vm907_vm3, %v414_v10  ;;  %v685_v51 = vmax.f32 %v496_v44, 0.0  ;;  %v686_v53 = vmax.f32 %v545_v46, 0.0 }
  0xb3   : > { %1606 = vmatmul.bf16.vlgmr.msra.gmra.mxu3 %v3378_v34  ;;  %v3383_v42 = vpack.c.bf16 %v683_v41, %v679_v40  ;;  %2508 = vmatmul.msk.bf16.gmra.mxu2 %vm907_vm3, %v414_v10  ;;  %v3422_v40 = vpack.c.bf16 %v406_v26, %v405_v25  ;;  %v2938_v25 = vld [vmem:[#allocation3 + $0x128] sm:$0xf0] }
  0xb6   : > { %v3387_v43 = vpop.f32.mrf.mxu3  ;;  %v593_v45 = vpop.f32.mrf.mxu2 }
  0xb7   : > { %v497_v47 = vpop.f32.mrf.mxu0  ;;  %v546_v49 = vpop.f32.mrf.mxu1  ;;  %v594_v57 = vadd.f32 %v593_v45, %v3368_v23 }
  0xb8   : > { %v498_v48 = vadd.f32 %v497_v47, %v3352_v14  ;;  %v547_v50 = vadd.f32 %v546_v49, %v3358_v16  ;;  %v2877_v49 = vld [vmem:[#allocation3 + $0x2d0] sm:$0xf] }
  0xb9   : > { %v687_v2 = vmax.f32 %v594_v57, 0.0 }
  0xba   : > { %v689_v52 = vmax.f32 %v498_v48, 0.0  ;;  %v690_v54 = vmax.f32 %v547_v50, 0.0  ;;  %v2992_v50 = vld [vmem:[#allocation3 + $0x2d8] sm:$0xf0] }
  0xbc   : > { %v3398_v59 = vpack.c.bf16 %v690_v54, %v686_v53  ;;  %v3400_v62 = vpack.c.bf16 %v689_v52, %v685_v51  ;;  %v2878_v52 = vor.u32 %v2992_v50, %v2877_v49  ;;  %v2685_v54 = vld [vmem:[#allocation3 + $0x150] sm:$0xf]  ;;  %v2989_v49 = vld [vmem:[#allocation3 + $0x2c0] sm:$0xf0] }
  0xbe   : > { %v3396_v58 = vpop.f32.mrf.mxu3  ;;  %v595_v60 = vpop.f32.mrf.mxu2  ;;  %1746 = vmatpush.bf16.msra.mxu2 %v2878_v52 }
  0xbf   : > { %v596_v63 = vadd.f32 %v595_v60, %v3368_v23  ;;  %v500_v0 = vpop.f32.mrf.mxu0  ;;  %v549_v1 = vpop.f32.mrf.mxu1  ;;  %v2686_v60 = vor.u32 %v2944_v55, %v2685_v54  ;;  %v2637_v55 = vld [vmem:[#allocation3 + $0xf0] sm:$0xf] }
  0xc0   : > { %v501_v9 = vadd.f32 %v500_v0, %v3352_v14  ;;  %v550_v11 = vadd.f32 %v549_v1, %v3358_v16 }
  0xc1   : > { %v691_v3 = vmax.f32 %v596_v63, 0.0  ;;  %2494 = vmatmul.msk.bf16.gmra.mxu0 %vm907_vm3, %v416_v61 }
  0xc2   : > { %2501 = vmatmul.msk.bf16.gmra.mxu1 %vm907_vm3, %v415_v36  ;;  %v693_v22 = vmax.f32 %v501_v9, 0.0  ;;  %v694_v28 = vmax.f32 %v550_v11, 0.0  ;;  %1648 = vmatpush.bf16.msra.mxu0 %v2686_v60  ;;  %v407_v9 = vld [vmem:[%s3334_s10 + $0x50] sm:$0xff] }
  0xc3   : > { %1611 = vmatmul.bf16.gmra.mxu3 %v3400_v62  ;;  %2509 = vmatmul.msk.bf16.gmra.mxu2 %vm907_vm3, %v415_v36  ;;  %v3407_v6 = vpack.c.bf16 %v691_v3, %v687_v2  ;;  %v2673_v3 = vld [vmem:[#allocation3 + $0x138] sm:$0xf] }
  0xc4   : > { %v2674_v11 = vor.u32 %v2941_v4, %v2673_v3  ;;  %v2769_v3 = vld [vmem:[#allocation3 + $0x1f8] sm:$0xf]  ;;  %v2965_v4 = vld [vmem:[#allocation3 + $0x200] sm:$0xf0] }
  0xc6   : > { %v3409_v8 = vpop.f32.mrf.mxu3  ;;  %v598_v10 = vpop.f32.mrf.mxu2  ;;  %1649 = vmatpush.bf16.msra.mxu0 %v2674_v11  ;;  %v2929_v11 = vld [vmem:[#allocation3 + $0xe0] sm:$0xf0] }
  0xc7   : > { %v502_v13 = vpop.f32.mrf.mxu0  ;;  %v551_v19 = vpop.f32.mrf.mxu1  ;;  %v599_v36 = vadd.f32 %v598_v10, %v3368_v23  ;;  %v408_v10 = vld [vmem:[%s3334_s10 + $0x58] sm:$0xff] }
  0xc8   : > { %v503_v18 = vadd.f32 %v502_v13, %v3352_v14  ;;  %v552_v20 = vadd.f32 %v551_v19, %v3358_v16  ;;  %v2781_v19 = vld [vmem:[#allocation3 + $0x210] sm:$0xf] }
  0xc9   : > { %v695_v47 = vmax.f32 %v599_v36, 0.0 }
  0xca   : > { %v697_v24 = vmax.f32 %v503_v18, 0.0  ;;  %v698_v29 = vmax.f32 %v552_v20, 0.0  ;;  %v2968_v20 = vld [vmem:[#allocation3 + $0x218] sm:$0xf0] }
  0xcb   : > { %v2782_v21 = vor.u32 %v2968_v20, %v2781_v19  ;;  %v409_v19 = vld [vmem:[%s3334_s10 + $0x60] sm:$0xff]  ;;  %v410_v20 = vld [vmem:[%s3334_s10 + $0x68] sm:$0xff] }
  0xcc   : > { %v3420_v38 = vpack.c.bf16 %v698_v29, %v694_v28  ;;  %v3424_v41 = vpack.c.bf16 %v697_v24, %v693_v22  ;;  %v2661_v24 = vld [vmem:[#allocation3 + $0x120] sm:$0xf]  ;;  %v3447_v28 = vpack.c.bf16 %v408_v10, %v407_v9  ;;  %v2770_v9 = vor.u32 %v2965_v4, %v2769_v3  ;;  %v2625_v10 = vld [vmem:[#allocation3 + $0xd8] sm:$0xf] }
  0xcd   : > { %1697 = vmatpush.bf16.msra.mxu1 %v2782_v21  ;;  %v2662_v30 = vor.u32 %v2938_v25, %v2661_v24  ;;  %v2626_v21 = vor.u32 %v2929_v11, %v2625_v10  ;;  %v2613_v25 = vld [vmem:[#allocation3 + $0xc0] sm:$0xf]  ;;  %v2603_v3 = vld [vmem:[#allocation3 + $0xb4] sm:$0xf0]  ;;  %v2733_v10 = vld [vmem:[#allocation3 + $0x1b0] sm:$0xf] }
  0xce   : > { %v3418_v37 = vpop.f32.mrf.mxu3  ;;  %v600_v39 = vpop.f32.mrf.mxu2  ;;  %v2956_v11 = vld [vmem:[#allocation3 + $0x1b8] sm:$0xf0] }
  0xcf   : > { %v601_v44 = vadd.f32 %v600_v39, %v3368_v23  ;;  %v505_v45 = vpop.f32.mrf.mxu0  ;;  %v554_v46 = vpop.f32.mrf.mxu1  ;;  %1650 = vmatpush.bf16.msra.mxu0 %v2662_v30  ;;  %v2757_v30 = vld [vmem:[#allocation3 + $0x1e0] sm:$0xf] }
  0xd0   : > { %v506_v56 = vadd.f32 %v505_v45, %v3352_v14  ;;  %v555_v63 = vadd.f32 %v554_v46, %v3358_v16  ;;  %v2649_v45 = vld [vmem:[#allocation3 + $0x108] sm:$0xf]  ;;  %v2935_v46 = vld [vmem:[#allocation3 + $0x110] sm:$0xf0] }
  0xd1   : > { %v699_v48 = vmax.f32 %v601_v44, 0.0  ;;  %2495 = vmatmul.msk.bf16.gmra.mxu0 %vm907_vm3, %v3422_v40  ;;  %1698 = vmatpush.bf16.msra.mxu1 %v2770_v9 }
  0xd2   : > { %2502 = vmatmul.msk.bf16.gmra.mxu1 %vm907_vm3, %v416_v61  ;;  %v701_v5 = vmax.f32 %v506_v56, 0.0  ;;  %v702_v13 = vmax.f32 %v555_v63, 0.0  ;;  %v2932_v56 = vld [vmem:[#allocation3 + $0xf8] sm:$0xf0] }
  0xd3   : > { %1616 = vmatmul.bf16.gmra.mxu3 %v3424_v41  ;;  %2510 = vmatmul.msk.bf16.gmra.mxu2 %vm907_vm3, %v416_v61  ;;  %v3432_v51 = vpack.c.bf16 %v699_v48, %v695_v47  ;;  %v2650_v47 = vor.u32 %v2935_v46, %v2649_v45  ;;  %v2865_v48 = vld [vmem:[#allocation3 + $0x2b8] sm:$0xf]  ;;  %v2638_v63 = vor.u32 %v2932_v56, %v2637_v55  ;;  %v2962_v45 = vld [vmem:[#allocation3 + $0x1e8] sm:$0xf0]  ;;  %v2853_v46 = vld [vmem:[#allocation3 + $0x2a0] sm:$0xf] }
  0xd4   : > { %v2866_v52 = vor.u32 %v2989_v49, %v2865_v48 }
  0xd5   : > { %1651 = vmatpush.bf16.msra.mxu0 %v2650_v47  ;;  %v2986_v47 = vld [vmem:[#allocation3 + $0x2a8] sm:$0xf0] }
  0xd6   : > { %v3434_v53 = vpop.f32.mrf.mxu3  ;;  %v603_v57 = vpop.f32.mrf.mxu2  ;;  %1747 = vmatpush.bf16.msra.mxu2 %v2866_v52  ;;  %v2758_v52 = vor.u32 %v2962_v45, %v2757_v30  ;;  %v2854_v56 = vor.u32 %v2986_v47, %v2853_v46  ;;  %v411_v47 = vld [vmem:[%s3334_s10 + $0x70] sm:$0xff] }
  0xd7   : > { %v507_v0 = vpop.f32.mrf.mxu0  ;;  %v556_v1 = vpop.f32.mrf.mxu1  ;;  %v604_v15 = vadd.f32 %v603_v57, %v3368_v23 }
  0xd8   : > { %v508_v61 = vadd.f32 %v507_v0, %v3352_v14  ;;  %v557_v2 = vadd.f32 %v556_v1, %v3358_v16  ;;  %1699 = vmatpush.bf16.msra.mxu1 %v2758_v52  ;;  %v2953_v52 = vld [vmem:[#allocation3 + $0x1a0] sm:$0xf0] }
  0xd9   : > { %v703_v39 = vmax.f32 %v604_v15, 0.0  ;;  %1652 = vmatpush.bf16.msra.mxu0 %v2638_v63  ;;  %v2745_v63 = vld [vmem:[#allocation3 + $0x1c8] sm:$0xf] }
  0xda   : > { %v705_v7 = vmax.f32 %v508_v61, 0.0  ;;  %v706_v18 = vmax.f32 %v557_v2, 0.0  ;;  %1748 = vmatpush.bf16.msra.mxu2 %v2854_v56 }
  0xdc   : > { %v3445_v26 = vpack.c.bf16 %v706_v18, %v702_v13  ;;  %v3449_v29 = vpack.c.bf16 %v705_v7, %v701_v5 }
  0xdd   : > { %1653 = vmatpush.bf16.msra.mxu0 %v2626_v21  ;;  %v2919_v21 = vld [vmem:[#allocation3 + $0x94] sm:$0xf] }
  0xde   : > { %v3443_v22 = vpop.f32.mrf.mxu3  ;;  %v605_v27 = vpop.f32.mrf.mxu2 }
  0xdf   : > { %v606_v31 = vadd.f32 %v605_v27, %v3368_v23  ;;  %v510_v35 = vpop.f32.mrf.mxu0  ;;  %v559_v36 = vpop.f32.mrf.mxu1  ;;  %v2926_v27 = vld [vmem:[#allocation3 + $0xc8] sm:$0xf0] }
  0xe0   : > { %v511_v57 = vadd.f32 %v510_v35, %v3352_v14  ;;  %v560_v0 = vadd.f32 %v559_v36, %v3358_v16  ;;  %v3474_v36 = vpack.c.bf16 %v410_v20, %v409_v19  ;;  %v2980_v20 = vld [vmem:[#allocation3 + $0x278] sm:$0xf0] }
  0xe1   : > { %v707_v44 = vmax.f32 %v606_v31, 0.0  ;;  %2496 = vmatmul.msk.bf16.gmra.mxu0 %vm907_vm3, %v3447_v28 }
  0xe2   : > { %2503 = vmatmul.msk.bf16.gmra.mxu1 %vm907_vm3, %v3422_v40  ;;  %v709_v5 = vmax.f32 %v511_v57, 0.0  ;;  %v710_v13 = vmax.f32 %v560_v0, 0.0  ;;  %v2959_v0 = vld [vmem:[#allocation3 + $0x1d0] sm:$0xf0] }
  0xe3   : > { %1621 = vmatmul.bf16.gmra.mxu3 %v3449_v29  ;;  %2511 = vmatmul.msk.bf16.gmra.mxu2 %vm907_vm3, %v3422_v40  ;;  %v3459_v50 = vpack.c.bf16 %v707_v44, %v703_v39  ;;  %v2614_v44 = vor.u32 %v2926_v27, %v2613_v25 }
  0xe5   : > { %4182 = vst [vmem:[#allocation9_spill] sm:$0xff] %v3459_v50  ;;  %1654 = vmatpush.bf16.msra.mxu0 %v2614_v44 }
  0xe6   : > { %v3461_v54 = vpop.f32.mrf.mxu3  ;;  %v608_v60 = vpop.f32.mrf.mxu2 }
  0xe7   : > { %v512_v40 = vpop.f32.mrf.mxu0  ;;  %v561_v1 = vpop.f32.mrf.mxu1  ;;  %v609_v15 = vadd.f32 %v608_v60, %v3368_v23 }
  0xe8   : > { %v513_v61 = vadd.f32 %v512_v40, %v3352_v14  ;;  %v562_v2 = vadd.f32 %v561_v1, %v3358_v16  ;;  %v2746_v40 = vor.u32 %v2959_v0, %v2745_v63  ;;  %v2983_v1 = vld [vmem:[#allocation3 + $0x290] sm:$0xf0]  ;;  %v2817_v63 = vld [vmem:[#allocation3 + $0x258] sm:$0xf] }
  0xe9   : > { %v711_v57 = vmax.f32 %v609_v15, 0.0  ;;  %v2591_v15 = vld [vmem:[#allocation3 + $0x9c] sm:$0xf0] }
  0xea   : > { %v713_v7 = vmax.f32 %v513_v61, 0.0  ;;  %v714_v18 = vmax.f32 %v562_v2, 0.0  ;;  %v2841_v61 = vld [vmem:[#allocation3 + $0x288] sm:$0xf]  ;;  %v2922_v2 = vld [vmem:[#allocation3 + $0xac] sm:$0xf]  ;;  %1700 = vmatpush.bf16.msra.mxu1 %v2746_v40  ;;  %v2594_v30 = vor.u32 %v2919_v21, %v2591_v15 }
  0xec   : > { %v3472_v31 = vpack.c.bf16 %v714_v18, %v710_v13  ;;  %v3476_v39 = vpack.c.bf16 %v713_v7, %v709_v5  ;;  %v2842_v5 = vor.u32 %v2983_v1, %v2841_v61  ;;  %v2606_v7 = vor.u32 %v2922_v2, %v2603_v3  ;;  %v2829_v13 = vld [vmem:[#allocation3 + $0x270] sm:$0xf]  ;;  %v2916_v61 = vld [vmem:[#allocation3 + $0x7c] sm:$0xf]  ;;  %v2579_v1 = vld [vmem:[#allocation3 + $0x84] sm:$0xf0] }
  0xed   : > { %v2830_v45 = vor.u32 %v2980_v20, %v2829_v13  ;;  %v2582_v3 = vor.u32 %v2916_v61, %v2579_v1  ;;  %v2805_v13 = vld [vmem:[#allocation3 + $0x240] sm:$0xf] }
  0xee   : > { %v3470_v24 = vpop.f32.mrf.mxu3  ;;  %v610_v35 = vpop.f32.mrf.mxu2  ;;  %1794 = vmatpush.bf16.msrb.mxu3 %v2606_v7  ;;  %1749 = vmatpush.bf16.msra.mxu2 %v2842_v5 }
  0xef   : > { %v611_v48 = vadd.f32 %v610_v35, %v3368_v23  ;;  %v515_v49 = vpop.f32.mrf.mxu0  ;;  %v564_v55 = vpop.f32.mrf.mxu1 }
  0xf0   : > { %v516_v18 = vadd.f32 %v515_v49, %v3352_v14  ;;  %v565_v25 = vadd.f32 %v564_v55, %v3358_v16  ;;  %v2721_v49 = vld [vmem:[#allocation3 + $0x198] sm:$0xf]  ;;  %v2977_v55 = vld [vmem:[#allocation3 + $0x260] sm:$0xf0] }
  0xf1   : > { %v715_v60 = vmax.f32 %v611_v48, 0.0  ;;  %2497 = vmatmul.msk.bf16.gmra.mxu0 %vm907_vm3, %v3474_v36  ;;  %v412_v48 = vld [vmem:[%s3334_s10 + $0x78] sm:$0xff]  ;;  %v2818_v2 = vor.u32 %v2977_v55, %v2817_v63  ;;  %v2543_v55 = vld [vmem:[#allocation3 + $0x3c] sm:$0xf0] }
  0xf2   : > { %2504 = vmatmul.msk.bf16.gmra.mxu1 %vm907_vm3, %v3447_v28  ;;  %v717_v56 = vmax.f32 %v516_v18, 0.0  ;;  %1795 = vmatpush.bf16.msrb.mxu3 %v2594_v30  ;;  %v718_v0 = vmax.f32 %v565_v25, 0.0  ;;  %v3501_v20 = vpack.c.bf16 %v412_v48, %v411_v47  ;;  %v2974_v25 = vld [vmem:[#allocation3 + $0x248] sm:$0xf0]  ;;  %v2567_v30 = vld [vmem:[#allocation3 + $0x6c] sm:$0xf0] }
  0xf3   : > { %1626 = vmatmul.bf16.gmra.mxu3 %v3476_v39  ;;  %2512 = vmatmul.msk.bf16.gmra.mxu2 %vm907_vm3, %v3447_v28  ;;  %v3486_v4 = vpack.c.bf16 %v715_v60, %v711_v57  ;;  %v2734_v28 = vor.u32 %v2956_v11, %v2733_v10  ;;  %v2722_v60 = vor.u32 %v2953_v52, %v2721_v49  ;;  %v2709_v10 = vld [vmem:[#allocation3 + $0x180] sm:$0xf]  ;;  %v2950_v11 = vld [vmem:[#allocation3 + $0x188] sm:$0xf0]  ;;  %v2555_v47 = vld [vmem:[#allocation3 + $0x54] sm:$0xf0] }
  0xf4   : > { %1750 = vmatpush.bf16.msra.mxu2 %v2830_v45  ;;  %v2710_v15 = vor.u32 %v2950_v11, %v2709_v10  ;;  %v2806_v45 = vor.u32 %v2974_v25, %v2805_v13  ;;  %v2907_v63 = vld [vmem:[#allocation3 + $0x34] sm:$0xf]  ;;  %v2904_v10 = vld [vmem:[#allocation3 + $0x1c] sm:$0xf]  ;;  %v2531_v11 = vld [vmem:[#allocation3 + $0x24] sm:$0xf0] }
  0xf5   : > { %4183 = vst [vmem:[#allocation10_spill] sm:$0xff] %v3486_v4  ;;  %1701 = vmatpush.bf16.msra.mxu1 %v2734_v28 }
  0xf6   : > { %v3488_v9 = vpop.f32.mrf.mxu3  ;;  %v613_v19 = vpop.f32.mrf.mxu2  ;;  %1796 = vmatpush.bf16.msrb.mxu3 %v2582_v3 }
  0xf7   : > { %v517_v27 = vpop.f32.mrf.mxu0  ;;  %v566_v44 = vpop.f32.mrf.mxu1  ;;  %v614_v5 = vadd.f32 %v613_v19, %v3368_v23 }
  0xf8   : > { %v518_v35 = vadd.f32 %v517_v27, %v3352_v14  ;;  %v567_v46 = vadd.f32 %v566_v44, %v3358_v16  ;;  %v2913_v27 = vld [vmem:[#allocation3 + $0x64] sm:$0xf]  ;;  %1751 = vmatpush.bf16.msra.mxu2 %v2818_v2 }
  0xf9   : > { %1702 = vmatpush.bf16.msra.mxu1 %v2722_v60  ;;  %v719_v49 = vmax.f32 %v614_v5, 0.0  ;;  %v2910_v60 = vld [vmem:[#allocation3 + $0x4c] sm:$0xf] }
  0xfa   : > { %v721_v57 = vmax.f32 %v518_v35, 0.0  ;;  %v722_v40 = vmax.f32 %v567_v46, 0.0  ;;  %v2570_v46 = vor.u32 %v2913_v27, %v2567_v30  ;;  %v2534_v27 = vor.u32 %v2904_v10, %v2531_v11 }
  0xfc   : > { %v3499_v18 = vpack.c.bf16 %v722_v40, %v718_v0  ;;  %v3503_v21 = vpack.c.bf16 %v721_v57, %v717_v56  ;;  %1752 = vmatpush.bf16.msra.mxu2 %v2806_v45  ;;  %1797 = vmatpush.bf16.msrb.mxu3 %v2570_v46  ;;  %v2558_v56 = vor.u32 %v2910_v60, %v2555_v47 }
  0xfd   : > { %1703 = vmatpush.bf16.msra.mxu1 %v2710_v15 }
  0xfe   : > { %v3497_v7 = vpop.f32.mrf.mxu3  ;;  %4184 = vst [vmem:[#allocation11_spill] sm:$0xff] %v3499_v18  ;;  %v615_v28 = vpop.f32.mrf.mxu2 }
  0xff   : > { %v616_v19 = vadd.f32 %v615_v28, %v3368_v23  ;;  %v520_v35 = vpop.f32.mrf.mxu0  ;;  %v569_v44 = vpop.f32.mrf.mxu1 }
 0x100   : > { %v521_v0 = vadd.f32 %v520_v35, %v3352_v14  ;;  %v570_v61 = vadd.f32 %v569_v44, %v3358_v16  ;;  %1798 = vmatpush.bf16.msrb.mxu3 %v2558_v56  ;;  %v2901_v35 = vld [vmem:[#allocation3 + $0x4] sm:$0xf]  ;;  %v2519_v44 = vld [vmem:[#allocation3 + $0xc] sm:$0xf0] }
 0x101   : > { %v723_v52 = vmax.f32 %v616_v19, 0.0  ;;  %2498 = vmatmul.msk.bf16.gmra.mxu0 %vm907_vm3, %v3501_v20  ;;  %v2522_v56 = vor.u32 %v2901_v35, %v2519_v44 }
 0x102   : > { %2505 = vmatmul.msk.bf16.gmra.mxu1 %vm907_vm3, %v3474_v36  ;;  %v725_v13 = vmax.f32 %v521_v0, 0.0  ;;  %v726_v15 = vmax.f32 %v570_v61, 0.0 }
 0x103   : > { %1631 = vmatmul.bf16.gmra.mxu3 %v3503_v21  ;;  %2513 = vmatmul.msk.bf16.gmra.mxu2 %vm907_vm3, %v3474_v36  ;;  %v3513_v48 = vpack.c.bf16 %v723_v52, %v719_v49  ;;  %v2546_v36 = vor.u32 %v2907_v63, %v2543_v55 }
 0x105   : > { %4185 = vst [vmem:[#allocation12_spill] sm:$0xff] %v3513_v48  ;;  %1799 = vmatpush.bf16.msrb.mxu3 %v2546_v36  ;;  %v526_v36 = vadd.f32 %v3362_v17, %v3352_v14 }
 0x106   : > { %v3515_v57 = vpop.f32.mrf.mxu3  ;;  %v618_v40 = vpop.f32.mrf.mxu2 }
 0x107   : > { %v522_v1 = vpop.f32.mrf.mxu0  ;;  %v571_v3 = vpop.f32.mrf.mxu1  ;;  %v619_v30 = vadd.f32 %v618_v40, %v3368_v23  ;;  %v3540_v40 = vperm.slane %v3349_v12, 3 }
 0x108   : > { %v523_v2 = vadd.f32 %v522_v1, %v3352_v14  ;;  %v572_v5 = vadd.f32 %v571_v3, %v3358_v16 }
 0x109   : > { %1800 = vmatpush.bf16.msrb.mxu3 %v2534_v27  ;;  %v727_v63 = vmax.f32 %v619_v30, 0.0  ;;  %v640_v12 = vadd.f32 %v3396_v58, %v3540_v40 }
 0x10a   : > { %v729_v28 = vmax.f32 %v523_v2, 0.0  ;;  %v730_v25 = vmax.f32 %v572_v5, 0.0  ;;  %v528_v5 = vadd.f32 %v3376_v33, %v3352_v14 }
 0x10b   : > { %v684_v30 = vmax.f32 %v640_v12, 0.0 }
 0x10c   : > { %v3524_v45 = vpack.c.bf16 %v730_v25, %v726_v15  ;;  %v3526_v49 = vpack.c.bf16 %v729_v28, %v725_v13  ;;  %v733_v15 = vmax.f32 %v526_v36, 0.0  ;;  %v737_v25 = vmax.f32 %v528_v5, 0.0 }
 0x10d   : > { %1801 = vmatpush.bf16.msrb.mxu3 %v2522_v56  ;;  %v645_v36 = vadd.f32 %v3418_v37, %v3540_v40 }
 0x10e   : > { %v3522_v19 = vpop.f32.mrf.mxu3  ;;  %4186 = vst [vmem:[#allocation13_spill] sm:$0xff] %v3524_v45  ;;  %v620_v46 = vpop.f32.mrf.mxu2  ;;  %v3562_v58 = vpack.c.bf16 %v737_v25, %v733_v15 }
 0x10f   : > { %v621_v52 = vadd.f32 %v620_v46, %v3368_v23  ;;  %v3529_v60 = vpop.f32.mrf.mxu0  ;;  %v574_v47 = vpop.f32.mrf.mxu1 }
 0x110   : > { %v575_v2 = vadd.f32 %v574_v47, %v3358_v16 }
 0x111   : > { %v731_v55 = vmax.f32 %v621_v52, 0.0  ;;  %1655 = vmatmul.bf16.vlgmr.msra.gmra.mxu0 %v3374_v32 }
 0x112   : > { %2506 = vmatmul.msk.bf16.gmra.mxu1 %vm907_vm3, %v3501_v20  ;;  %v734_v13 = vmax.f32 %v575_v2, 0.0  ;;  %v643_v2 = vadd.f32 %v3409_v8, %v3540_v40 }
 0x113   : > { %1636 = vmatmul.bf16.gmra.mxu3 %v3526_v49  ;;  %2514 = vmatmul.msk.bf16.gmra.mxu2 %vm907_vm3, %v3501_v20  ;;  %v3537_v0 = vpack.c.bf16 %v731_v55, %v727_v63  ;;  %v638_v20 = vadd.f32 %v3387_v43, %v3540_v40 }
 0x114   : > { %v688_v5 = vmax.f32 %v643_v2, 0.0 }
 0x115   : > { %v680_v27 = vmax.f32 %v638_v20, 0.0 }
 0x116   : > { %v3542_v61 = vpop.f32.mrf.mxu3  ;;  %v623_v1 = vpop.f32.mrf.mxu2 }
 0x117   : > { %v950_v3 = vpop.f32.mrf.mxu0  ;;  %v576_v10 = vpop.f32.mrf.mxu1  ;;  %v624_v17 = vadd.f32 %v623_v1, %v3368_v23 }
 0x118   : > { %v577_v11 = vadd.f32 %v576_v10, %v3358_v16  ;;  %v3564_v16 = vpack.c.bf16 %v684_v30, %v680_v27  ;;  %v692_v10 = vmax.f32 %v645_v36, 0.0  ;;  %v648_v30 = vadd.f32 %v3434_v53, %v3540_v40  ;;  %v2994_v53 = vld [vmem:[#allocation3 + $0x2ec] sm:$0xf] }
 0x119   : > { %v735_v52 = vmax.f32 %v624_v17, 0.0  ;;  %v650_v17 = vadd.f32 %v3443_v22, %v3540_v40  ;;  %v2891_v22 = vld [vmem:[#allocation3 + $0x2f4] sm:$0xf0] }
 0x11a   : > { %v738_v28 = vmax.f32 %v577_v11, 0.0 }
 0x11c   : > { %v3557_v14 = vpack.c.bf16 %v738_v28, %v734_v13  ;;  %v3590_v28 = vpack.c.bf16 %v692_v10, %v688_v5  ;;  %v2894_v10 = vor.u32 %v2994_v53, %v2891_v22  ;;  %v655_v53 = vadd.f32 %v3470_v24, %v3540_v40  ;;  %v2879_v24 = vld [vmem:[#allocation3 + $0x2dc] sm:$0xf0] }
 0x11e   : > { %v3555_v35 = vpop.f32.mrf.mxu3  ;;  %v625_v33 = vpop.f32.mrf.mxu2  ;;  %1941 = vmatpush.bf16.msrb.mxu2 %v2894_v10  ;;  %v708_v10 = vmax.f32 %v655_v53, 0.0 }
 0x11f   : > { %v626_v43 = vadd.f32 %v625_v33, %v3368_v23  ;;  %v953_v44 = vpop.f32.mrf.mxu0  ;;  %v3560_v46 = vpop.f32.mrf.mxu1  ;;  %v696_v33 = vmax.f32 %v648_v30, 0.0 }
 0x120   : > { %4187 = vst [vmem:[#allocation14_spill] sm:$0xff] %v3560_v46 }
 0x121   : > { %v739_v47 = vmax.f32 %v626_v43, 0.0  ;;  %1660 = vmatmul.bf16.gmra.mxu0 %v3398_v59  ;;  %v700_v43 = vmax.f32 %v650_v17, 0.0  ;;  %v2946_v17 = vld [vmem:[#allocation3 + $0x16c] sm:$0xf] }
 0x122   : > { %1704 = vmatmul.bf16.vlgmr.msra.gmra.mxu1 %v3383_v42 }
 0x123   : > { %1641 = vmatmul.bf16.gmra.mxu3 %v3562_v58  ;;  %1753 = vmatmul.bf16.vlgmr.msra.gmra.mxu2 %v3564_v16  ;;  %v3570_v56 = vpack.c.bf16 %v739_v47, %v735_v52  ;;  %v3617_v5 = vpack.c.bf16 %v700_v43, %v696_v33  ;;  %v2699_v33 = vld [vmem:[#allocation3 + $0x174] sm:$0xf0] }
 0x125   : > { %4188 = vst [vmem:[#allocation15_spill] sm:$0xff] %v3570_v56 }
 0x126   : > { %v3572_v23 = vpop.f32.mrf.mxu3  ;;  %v3574_v63 = vpop.f32.mrf.mxu2 }
 0x127   : > { %4189 = vst [vmem:[#allocation16_spill] sm:$0xff] %v3574_v63  ;;  %v955_v55 = vpop.f32.mrf.mxu0  ;;  %v3576_v1 = vpop.f32.mrf.mxu1  ;;  %v653_v63 = vadd.f32 %v3461_v54, %v3540_v40  ;;  %v2991_v54 = vld [vmem:[#allocation3 + $0x2d4] sm:$0xf] }
 0x128   : > { %4190 = vst [vmem:[#allocation17_spill] sm:$0xff] %v3576_v1 }
 0x12e   : > { %v3582_v20 = vpop.f32.mrf.mxu3  ;;  %v3584_v12 = vpop.f32.mrf.mxu2 }
 0x12f   : > { %4191 = vst [vmem:[#allocation18_spill] sm:$0xff] %v3584_v12  ;;  %v3586_v11 = vpop.f32.mrf.mxu0  ;;  %v3588_v13 = vpop.f32.mrf.mxu1  ;;  %v2795_v12 = vld [vmem:[#allocation3 + $0x234] sm:$0xf0] }
 0x130   : > { %4192 = vst [vmem:[#allocation19_spill] sm:$0xff] %v3588_v13 }
 0x131   : > { %1665 = vmatmul.bf16.gmra.mxu0 %v3420_v38 }
 0x132   : > { %1709 = vmatmul.bf16.gmra.mxu1 %v3407_v6 }
 0x133   : > { %1802 = vmatmul.bf16.vlgmr.msrb.gmra.mxu3 %v3378_v34  ;;  %1758 = vmatmul.bf16.gmra.mxu2 %v3590_v28 }
 0x136   : > { %v1607_v8 = vpop.f32.mrf.mxu3  ;;  %v3596_v37 = vpop.f32.mrf.mxu2 }
 0x137   : > { %4193 = vst [vmem:[#allocation20_spill] sm:$0xff] %v3596_v37  ;;  %v3599_v15 = vadd.f32 %v1607_v8, %v3529_v60  ;;  %v3601_v25 = vpop.f32.mrf.mxu0  ;;  %v3603_v27 = vpop.f32.mrf.mxu1  ;;  %v2970_v37 = vld [vmem:[#allocation3 + $0x22c] sm:$0xf] }
 0x138   : > { %4194 = vst [vmem:[#allocation21_spill] sm:$0xff] %v3603_v27  ;;  %v2798_v22 = vor.u32 %v2970_v37, %v2795_v12  ;;  %v2687_v37 = vld [vmem:[#allocation3 + $0x15c] sm:$0xf0]  ;;  %v2675_v27 = vld [vmem:[#allocation3 + $0x144] sm:$0xf0] }
 0x13a   : > { %1892 = vmatpush.bf16.msrb.mxu1 %v2798_v22 }
 0x13e   : > { %v1609_v52 = vpop.f32.mrf.mxu3  ;;  %v3609_v47 = vpop.f32.mrf.mxu2 }
 0x13f   : > { %4195 = vst [vmem:[#allocation22_spill] sm:$0xff] %v3609_v47  ;;  %v3611_v2 = vadd.f32 %v1609_v52, %v950_v3  ;;  %v3613_v36 = vpop.f32.mrf.mxu0  ;;  %v3615_v60 = vpop.f32.mrf.mxu1  ;;  %v2702_v52 = vor.u32 %v2946_v17, %v2699_v33 }
 0x140   : > { %4196 = vst [vmem:[#allocation23_spill] sm:$0xff] %v3615_v60 }
 0x141   : > { %1670 = vmatmul.bf16.gmra.mxu0 %v3445_v26 }
 0x142   : > { %1714 = vmatmul.bf16.gmra.mxu1 %v3432_v51  ;;  %1843 = vmatpush.bf16.msrb.mxu0 %v2702_v52 }
 0x143   : > { %1807 = vmatmul.bf16.gmra.mxu3 %v3400_v62  ;;  %1763 = vmatmul.bf16.gmra.mxu2 %v3617_v5 }
 0x146   : > { %v1612_v8 = vpop.f32.mrf.mxu3  ;;  %v3623_v3 = vpop.f32.mrf.mxu2 }
 0x147   : > { %4197 = vst [vmem:[#allocation24_spill] sm:$0xff] %v3623_v3  ;;  %v3625_v30 = vadd.f32 %v1612_v8, %v953_v44  ;;  %v3627_v43 = vpop.f32.mrf.mxu0  ;;  %v3629_v47 = vpop.f32.mrf.mxu1  ;;  %v704_v44 = vmax.f32 %v653_v63, 0.0  ;;  %v2882_v63 = vor.u32 %v2991_v54, %v2879_v24  ;;  %v658_v54 = vadd.f32 %v3488_v9, %v3540_v40 }
 0x148   : > { %4198 = vst [vmem:[#allocation25_spill] sm:$0xff] %v3629_v47  ;;  %v660_v24 = vadd.f32 %v3497_v7, %v3540_v40 }
 0x149   : > { %v3643_v47 = vpack.c.bf16 %v708_v10, %v704_v44  ;;  %1942 = vmatpush.bf16.msrb.mxu2 %v2882_v63  ;;  %v712_v63 = vmax.f32 %v658_v54, 0.0  ;;  %v2931_v54 = vld [vmem:[#allocation3 + $0xf4] sm:$0xf] }
 0x14b   : > { %4201 = vst [vmem:[#allocation28_spill] sm:$0xff] %v3643_v47 }
 0x14e   : > { %v1614_v8 = vpop.f32.mrf.mxu3  ;;  %v3635_v3 = vpop.f32.mrf.mxu2 }
 0x14f   : > { %4199 = vst [vmem:[#allocation26_spill] sm:$0xff] %v3635_v3  ;;  %v3637_v60 = vadd.f32 %v1614_v8, %v955_v55  ;;  %v3639_v17 = vpop.f32.mrf.mxu0  ;;  %v3641_v33 = vpop.f32.mrf.mxu1  ;;  %v2943_v55 = vld [vmem:[#allocation3 + $0x154] sm:$0xf]  ;;  %v2783_v3 = vld [vmem:[#allocation3 + $0x21c] sm:$0xf0] }
 0x150   : > { %4200 = vst [vmem:[#allocation27_spill] sm:$0xff] %v3641_v33  ;;  %v2690_v22 = vor.u32 %v2943_v55, %v2687_v37  ;;  %v2967_v8 = vld [vmem:[#allocation3 + $0x214] sm:$0xf]  ;;  %v2940_v33 = vld [vmem:[#allocation3 + $0x13c] sm:$0xf] }
 0x151   : > { %1675 = vmatmul.bf16.gmra.mxu0 %v3472_v31  ;;  %v2937_v37 = vld [vmem:[#allocation3 + $0x124] sm:$0xf] }
 0x152   : > { %1719 = vmatmul.bf16.gmra.mxu1 %v3459_v50  ;;  %1844 = vmatpush.bf16.msrb.mxu0 %v2690_v22 }
 0x153   : > { %1812 = vmatmul.bf16.gmra.mxu3 %v3424_v41  ;;  %1768 = vmatmul.bf16.gmra.mxu2 %v3643_v47 }
 0x156   : > { %v1617_v12 = vpop.f32.mrf.mxu3  ;;  %v3649_v52 = vpop.f32.mrf.mxu2 }
 0x157   : > { %4202 = vst [vmem:[#allocation29_spill] sm:$0xff] %v3649_v52  ;;  %v3652_v53 = vadd.f32 %v1617_v12, %v3586_v11  ;;  %v3654_v44 = vpop.f32.mrf.mxu0  ;;  %v3656_v10 = vpop.f32.mrf.mxu1  ;;  %v2786_v52 = vor.u32 %v2967_v8, %v2783_v3  ;;  %v2678_v11 = vor.u32 %v2940_v33, %v2675_v27  ;;  %v716_v12 = vmax.f32 %v660_v24, 0.0  ;;  %v2934_v27 = vld [vmem:[#allocation3 + $0x10c] sm:$0xf]  ;;  %v2651_v3 = vld [vmem:[#allocation3 + $0x114] sm:$0xf0] }
 0x158   : > { %4203 = vst [vmem:[#allocation30_spill] sm:$0xff] %v3656_v10  ;;  %v2663_v10 = vld [vmem:[#allocation3 + $0x12c] sm:$0xf0]  ;;  %v2654_v33 = vor.u32 %v2934_v27, %v2651_v3  ;;  %v2964_v3 = vld [vmem:[#allocation3 + $0x1fc] sm:$0xf] }
 0x159   : > { %1893 = vmatpush.bf16.msrb.mxu1 %v2786_v52  ;;  %1845 = vmatpush.bf16.msrb.mxu0 %v2678_v11  ;;  %v2666_v1 = vor.u32 %v2937_v37, %v2663_v10  ;;  %v3671_v7 = vpack.c.bf16 %v716_v12, %v712_v63  ;;  %v2867_v52 = vld [vmem:[#allocation3 + $0x2c4] sm:$0xf0]  ;;  %v665_v37 = vadd.f32 %v3522_v19, %v3540_v40 }
 0x15b   : > { %4206 = vst [vmem:[#allocation33_spill] sm:$0xff] %v3671_v7 }
 0x15d   : > { %1846 = vmatpush.bf16.msrb.mxu0 %v2666_v1  ;;  %v2639_v1 = vld [vmem:[#allocation3 + $0xfc] sm:$0xf0] }
 0x15e   : > { %v1619_v55 = vpop.f32.mrf.mxu3  ;;  %v3662_v22 = vpop.f32.mrf.mxu2  ;;  %v2642_v63 = vor.u32 %v2931_v54, %v2639_v1  ;;  %v2925_v1 = vld [vmem:[#allocation3 + $0xc4] sm:$0xf] }
 0x15f   : > { %4204 = vst [vmem:[#allocation31_spill] sm:$0xff] %v3662_v22  ;;  %v3665_v13 = vadd.f32 %v1619_v55, %v3601_v25  ;;  %v3667_v9 = vpop.f32.mrf.mxu0  ;;  %v3669_v46 = vpop.f32.mrf.mxu1  ;;  %v2988_v25 = vld [vmem:[#allocation3 + $0x2bc] sm:$0xf]  ;;  %v663_v55 = vadd.f32 %v3515_v57, %v3540_v40  ;;  %v2615_v22 = vld [vmem:[#allocation3 + $0xcc] sm:$0xf0] }
 0x160   : > { %4205 = vst [vmem:[#allocation32_spill] sm:$0xff] %v3669_v46  ;;  %v2870_v10 = vor.u32 %v2988_v25, %v2867_v52  ;;  %v2928_v25 = vld [vmem:[#allocation3 + $0xdc] sm:$0xf]  ;;  %v2961_v57 = vld [vmem:[#allocation3 + $0x1e4] sm:$0xf] }
 0x161   : > { %1680 = vmatmul.bf16.gmra.mxu0 %v3499_v18 }
 0x162   : > { %1724 = vmatmul.bf16.gmra.mxu1 %v3486_v4  ;;  %1847 = vmatpush.bf16.msrb.mxu0 %v2654_v33  ;;  %v2771_v33 = vld [vmem:[#allocation3 + $0x204] sm:$0xf0]  ;;  %v2855_v4 = vld [vmem:[#allocation3 + $0x2ac] sm:$0xf0] }
 0x163   : > { %1817 = vmatmul.bf16.gmra.mxu3 %v3449_v29  ;;  %1773 = vmatmul.bf16.gmra.mxu2 %v3671_v7  ;;  %v2774_v52 = vor.u32 %v2964_v3, %v2771_v33  ;;  %v2985_v7 = vld [vmem:[#allocation3 + $0x2a4] sm:$0xf] }
 0x164   : > { %1943 = vmatpush.bf16.msrb.mxu2 %v2870_v10  ;;  %v720_v10 = vmax.f32 %v663_v55, 0.0  ;;  %v2858_v33 = vor.u32 %v2985_v7, %v2855_v4 }
 0x165   : > { %1894 = vmatpush.bf16.msrb.mxu1 %v2774_v52  ;;  %v2747_v52 = vld [vmem:[#allocation3 + $0x1d4] sm:$0xf0] }
 0x166   : > { %v1622_v8 = vpop.f32.mrf.mxu3  ;;  %v3677_v24 = vpop.f32.mrf.mxu2  ;;  %1848 = vmatpush.bf16.msrb.mxu0 %v2642_v63  ;;  %v2618_v63 = vor.u32 %v2925_v1, %v2615_v22  ;;  %v2843_v22 = vld [vmem:[#allocation3 + $0x294] sm:$0xf0]  ;;  %v2924_v1 = vld [vmem:[#allocation3 + $0xb8] sm:$0xf0] }
 0x167   : > { %4207 = vst [vmem:[#allocation34_spill] sm:$0xff] %v3677_v24  ;;  %v3680_v11 = vadd.f32 %v1622_v8, %v3613_v36  ;;  %v3682_v12 = vpop.f32.mrf.mxu0  ;;  %v3688_v27 = vpop.f32.mrf.mxu1  ;;  %v2627_v24 = vld [vmem:[#allocation3 + $0xe4] sm:$0xf0]  ;;  %v724_v8 = vmax.f32 %v665_v37, 0.0 }
 0x168   : > { %4208 = vst [vmem:[#allocation35_spill] sm:$0xff] %v3688_v27  ;;  %v2630_v36 = vor.u32 %v2928_v25, %v2627_v24  ;;  %v2759_v27 = vld [vmem:[#allocation3 + $0x1ec] sm:$0xf0]  ;;  %1944 = vmatpush.bf16.msrb.mxu2 %v2858_v33  ;;  %v2958_v25 = vld [vmem:[#allocation3 + $0x1cc] sm:$0xf] }
 0x169   : > { %v2762_v24 = vor.u32 %v2961_v57, %v2759_v27  ;;  %v3699_v37 = vpack.c.bf16 %v724_v8, %v720_v10  ;;  %v2955_v10 = vld [vmem:[#allocation3 + $0x1b4] sm:$0xf]  ;;  %v2735_v8 = vld [vmem:[#allocation3 + $0x1bc] sm:$0xf0] }
 0x16a   : > { %1849 = vmatpush.bf16.msrb.mxu0 %v2630_v36  ;;  %v2982_v36 = vld [vmem:[#allocation3 + $0x28c] sm:$0xf]  ;;  %v2979_v57 = vld [vmem:[#allocation3 + $0x274] sm:$0xf]  ;;  %v2738_v33 = vor.u32 %v2955_v10, %v2735_v8  ;;  %v2819_v10 = vld [vmem:[#allocation3 + $0x264] sm:$0xf0] }
 0x16b   : > { %4211 = vst [vmem:[#allocation38_spill] sm:$0xff] %v3699_v37  ;;  %1895 = vmatpush.bf16.msrb.mxu1 %v2762_v24  ;;  %v2846_v4 = vor.u32 %v2982_v36, %v2843_v22  ;;  %v2585_v8 = vld [vmem:[#allocation3 + $0x80] sm:$0xf] }
 0x16d   : > { %1945 = vmatpush.bf16.msrb.mxu2 %v2846_v4  ;;  %v2952_v4 = vld [vmem:[#allocation3 + $0x19c] sm:$0xf] }
 0x16e   : > { %v1624_v54 = vpop.f32.mrf.mxu3  ;;  %v3690_v46 = vpop.f32.mrf.mxu2  ;;  %1850 = vmatpush.bf16.msrb.mxu0 %v2618_v63 }
 0x16f   : > { %4209 = vst [vmem:[#allocation36_spill] sm:$0xff] %v3690_v46  ;;  %v3693_v19 = vadd.f32 %v1624_v54, %v3627_v43  ;;  %v3695_v3 = vpop.f32.mrf.mxu0  ;;  %v3697_v55 = vpop.f32.mrf.mxu1  ;;  %v2750_v43 = vor.u32 %v2958_v25, %v2747_v52  ;;  %v2609_v54 = vld [vmem:[#allocation3 + $0xb0] sm:$0xf]  ;;  %v2831_v25 = vld [vmem:[#allocation3 + $0x27c] sm:$0xf0] }
 0x170   : > { %4210 = vst [vmem:[#allocation37_spill] sm:$0xff] %v3697_v55  ;;  %v2610_v7 = vor.u32 %v2924_v1, %v2609_v54  ;;  %v2597_v52 = vld [vmem:[#allocation3 + $0x98] sm:$0xf]  ;;  %v2921_v46 = vld [vmem:[#allocation3 + $0xa0] sm:$0xf0]  ;;  %v2834_v36 = vor.u32 %v2979_v57, %v2831_v25  ;;  %v670_v54 = vadd.f32 %v3555_v35, %v3540_v40 }
 0x171   : > { %1685 = vmatmul.bf16.gmra.mxu0 %v3524_v45  ;;  %1896 = vmatpush.bf16.msrb.mxu1 %v2750_v43  ;;  %v2598_v22 = vor.u32 %v2921_v46, %v2597_v52  ;;  %v668_v43 = vadd.f32 %v3542_v61, %v3540_v40  ;;  %v2949_v35 = vld [vmem:[#allocation3 + $0x184] sm:$0xf] }
 0x172   : > { %1729 = vmatmul.bf16.gmra.mxu1 %v3513_v48  ;;  %1990 = vmatpush.bf16.msra.mxu3 %v2610_v7  ;;  %v732_v52 = vmax.f32 %v670_v54, 0.0 }
 0x173   : > { %1822 = vmatmul.bf16.gmra.mxu3 %v3476_v39  ;;  %1778 = vmatmul.bf16.gmra.mxu2 %v3699_v37  ;;  %v728_v25 = vmax.f32 %v668_v43, 0.0  ;;  %v2711_v37 = vld [vmem:[#allocation3 + $0x18c] sm:$0xf0] }
 0x174   : > { %1946 = vmatpush.bf16.msrb.mxu2 %v2834_v36  ;;  %v2714_v36 = vor.u32 %v2949_v35, %v2711_v37 }
 0x175   : > { %1897 = vmatpush.bf16.msrb.mxu1 %v2738_v33 }
 0x176   : > { %v1627_v27 = vpop.f32.mrf.mxu3  ;;  %v3705_v63 = vpop.f32.mrf.mxu2  ;;  %1991 = vmatpush.bf16.msra.mxu3 %v2598_v22  ;;  %v2915_v22 = vld [vmem:[#allocation3 + $0x70] sm:$0xf0] }
 0x177   : > { %4212 = vst [vmem:[#allocation39_spill] sm:$0xff] %v3705_v63  ;;  %v3708_v24 = vadd.f32 %v1627_v27, %v3639_v17  ;;  %v3710_v55 = vpop.f32.mrf.mxu0  ;;  %v3716_v1 = vpop.f32.mrf.mxu1  ;;  %v2723_v17 = vld [vmem:[#allocation3 + $0x1a4] sm:$0xf0]  ;;  %v2976_v27 = vld [vmem:[#allocation3 + $0x25c] sm:$0xf] }
 0x178   : > { %4213 = vst [vmem:[#allocation40_spill] sm:$0xff] %v3716_v1  ;;  %v2726_v7 = vor.u32 %v2952_v4, %v2723_v17  ;;  %v2918_v63 = vld [vmem:[#allocation3 + $0x88] sm:$0xf0]  ;;  %v2822_v57 = vor.u32 %v2976_v27, %v2819_v10  ;;  %v2973_v1 = vld [vmem:[#allocation3 + $0x244] sm:$0xf] }
 0x179   : > { %v2586_v46 = vor.u32 %v2918_v63, %v2585_v8  ;;  %v2807_v4 = vld [vmem:[#allocation3 + $0x24c] sm:$0xf0]  ;;  %v2573_v17 = vld [vmem:[#allocation3 + $0x68] sm:$0xf]  ;;  %v2912_v8 = vld [vmem:[#allocation3 + $0x58] sm:$0xf0] }
 0x17a   : > { %1898 = vmatpush.bf16.msrb.mxu1 %v2726_v7  ;;  %1947 = vmatpush.bf16.msrb.mxu2 %v2822_v57  ;;  %v2810_v63 = vor.u32 %v2973_v1, %v2807_v4  ;;  %v2574_v54 = vor.u32 %v2915_v22, %v2573_v17  ;;  %v3727_v7 = vpack.c.bf16 %v732_v52, %v728_v25  ;;  %v2561_v10 = vld [vmem:[#allocation3 + $0x50] sm:$0xf]  ;;  %v2549_v1 = vld [vmem:[#allocation3 + $0x38] sm:$0xf]  ;;  %v2909_v57 = vld [vmem:[#allocation3 + $0x40] sm:$0xf0] }
 0x17b   : > { %1992 = vmatpush.bf16.msra.mxu3 %v2586_v46  ;;  %v2550_v35 = vor.u32 %v2909_v57, %v2549_v1  ;;  %v675_v4 = vadd.f32 %v3582_v20, %v3540_v40  ;;  %v2537_v17 = vld [vmem:[#allocation3 + $0x20] sm:$0xf]  ;;  %v2906_v22 = vld [vmem:[#allocation3 + $0x28] sm:$0xf0] }
 0x17c   : > { %4216 = vst [vmem:[#allocation43_spill] sm:$0xff] %v3727_v7 }
 0x17e   : > { %v1629_v61 = vpop.f32.mrf.mxu3  ;;  %v3718_v48 = vpop.f32.mrf.mxu2  ;;  %1899 = vmatpush.bf16.msrb.mxu1 %v2714_v36  ;;  %1948 = vmatpush.bf16.msrb.mxu2 %v2810_v63  ;;  %v673_v36 = vadd.f32 %v3572_v23, %v3540_v40  ;;  %v2538_v63 = vor.u32 %v2906_v22, %v2537_v17 }
 0x17f   : > { %4214 = vst [vmem:[#allocation41_spill] sm:$0xff] %v3718_v48  ;;  %v3721_v33 = vadd.f32 %v1629_v61, %v3654_v44  ;;  %v3723_v27 = vpop.f32.mrf.mxu0  ;;  %v3725_v43 = vpop.f32.mrf.mxu1  ;;  %1993 = vmatpush.bf16.msra.mxu3 %v2574_v54  ;;  %v2562_v44 = vor.u32 %v2912_v8, %v2561_v10  ;;  %v740_v10 = vmax.f32 %v675_v4, 0.0  ;;  %v2525_v8 = vld [vmem:[#allocation3 + $0x8] sm:$0xf] }
 0x180   : > { %4215 = vst [vmem:[#allocation42_spill] sm:$0xff] %v3725_v43  ;;  %v736_v54 = vmax.f32 %v673_v36, 0.0  ;;  %v2633_v43 = vld [vmem:[#allocation3 + $0xe0] sm:$0xf] }
 0x181   : > { %1690 = vmatmul.bf16.gmra.mxu0 %v3557_v14 }
 0x182   : > { %1734 = vmatmul.bf16.gmra.mxu1 %v3537_v0  ;;  %v3754_v20 = vpack.c.bf16 %v740_v10, %v736_v54 }
 0x183   : > { %1827 = vmatmul.bf16.gmra.mxu3 %v3503_v21  ;;  %1783 = vmatmul.bf16.gmra.mxu2 %v3727_v7 }
 0x184   : > { %1994 = vmatpush.bf16.msra.mxu3 %v2562_v44  ;;  %4221 = vst [vmem:[#allocation48_spill] sm:$0xff] %v3754_v20 }
 0x186   : > { %v1632_v37 = vpop.f32.mrf.mxu3  ;;  %v3733_v46 = vpop.f32.mrf.mxu2 }
 0x187   : > { %4217 = vst [vmem:[#allocation44_spill] sm:$0xff] %v3733_v46  ;;  %v3736_v25 = vadd.f32 %v1632_v37, %v3667_v9  ;;  %v3738_v52 = vpop.f32.mrf.mxu0  ;;  %v3740_v61 = vpop.f32.mrf.mxu1  ;;  %v2903_v37 = vld [vmem:[#allocation3 + $0x10] sm:$0xf0] }
 0x188   : > { %4218 = vst [vmem:[#allocation45_spill] sm:$0xff] %v3740_v61  ;;  %1995 = vmatpush.bf16.msra.mxu3 %v2550_v35  ;;  %v2526_v40 = vor.u32 %v2903_v37, %v2525_v8 }
 0x18c   : > { %1996 = vmatpush.bf16.msra.mxu3 %v2538_v63 }
 0x18e   : > { %v1634_v9 = vpop.f32.mrf.mxu3  ;;  %v3746_v48 = vpop.f32.mrf.mxu2 }
 0x18f   : > { %4219 = vst [vmem:[#allocation46_spill] sm:$0xff] %v3746_v48  ;;  %v3749_v44 = vadd.f32 %v1634_v9, %v3682_v12  ;;  %v1656_v1 = vpop.f32.mrf.mxu0  ;;  %v3751_v57 = vpop.f32.mrf.mxu1 }
 0x190   : > { %4220 = vst [vmem:[#allocation47_spill] sm:$0xff] %v3751_v57  ;;  %v1657_v23 = vadd.f32 %v1656_v1, %v3599_v15  ;;  %1997 = vmatpush.bf16.msra.mxu3 %v2526_v40 }
 0x191   : > { %1851 = vmatmul.bf16.vlgmr.msrb.gmra.mxu0 %v3374_v32 }
 0x192   : > { %1739 = vmatmul.bf16.gmra.mxu1 %v3570_v56 }
 0x193   : > { %1832 = vmatmul.bf16.gmra.mxu3 %v3526_v49  ;;  %1788 = vmatmul.bf16.gmra.mxu2 %v3754_v20 }
 0x196   : > { %v1637_v12 = vpop.f32.mrf.mxu3  ;;  %v3760_v35 = vpop.f32.mrf.mxu2 }
 0x197   : > { %4222 = vst [vmem:[#allocation49_spill] sm:$0xff] %v3760_v35  ;;  %v3763_v36 = vadd.f32 %v1637_v12, %v3695_v3  ;;  %v1658_v15 = vpop.f32.mrf.mxu0  ;;  %v3765_v4 = vpop.f32.mrf.mxu1  ;;  %v2669_v35 = vld [vmem:[#allocation3 + $0x128] sm:$0xf] }
 0x198   : > { %4223 = vst [vmem:[#allocation50_spill] sm:$0xff] %v3765_v4  ;;  %v1659_v17 = vadd.f32 %v1658_v15, %v3611_v2  ;;  %v2930_v4 = vld [vmem:[#allocation3 + $0xe8] sm:$0xf0] }
 0x199   : > { %v2634_v57 = vor.u32 %v2930_v4, %v2633_v43  ;;  %v2849_v4 = vld [vmem:[#allocation3 + $0x290] sm:$0xf] }
 0x19e   : > { %v1639_v22 = vpop.f32.mrf.mxu3  ;;  %v3768_v63 = vpop.f32.mrf.mxu2 }
 0x19f   : > { %4224 = vst [vmem:[#allocation51_spill] sm:$0xff] %v3768_v63  ;;  %v3771_v54 = vadd.f32 %v1639_v22, %v3710_v55  ;;  %v1661_v10 = vpop.f32.mrf.mxu0  ;;  %v1705_v8 = vpop.f32.mrf.mxu1 }
 0x1a0   : > { %v1662_v9 = vadd.f32 %v1661_v10, %v3625_v30  ;;  %v1706_v37 = vadd.f32 %v1705_v8, %v1657_v23 }
 0x1a1   : > { %1856 = vmatmul.bf16.gmra.mxu0 %v3398_v59 }
 0x1a2   : > { %1900 = vmatmul.bf16.vlgmr.msrb.gmra.mxu1 %v3383_v42 }
 0x1a3   : > { %1837 = vmatmul.bf16.gmra.mxu3 %v3562_v58  ;;  %1949 = vmatmul.bf16.vlgmr.msrb.gmra.mxu2 %v3564_v16 }
 0x1a6   : > { %v1642_v2 = vpop.f32.mrf.mxu3  ;;  %v1754_v1 = vpop.f32.mrf.mxu2 }
 0x1a7   : > { %v3779_v3 = vadd.f32 %v1642_v2, %v3723_v27  ;;  %v3781_v55 = vadd.f32 %v1754_v1, %v1706_v37  ;;  %v1663_v40 = vpop.f32.mrf.mxu0  ;;  %v1707_v12 = vpop.f32.mrf.mxu1 }
 0x1a8   : > { %v1664_v30 = vadd.f32 %v1663_v40, %v3637_v60  ;;  %v1708_v23 = vadd.f32 %v1707_v12, %v1659_v17 }
 0x1a9   : > { %4225 = vst [vmem:[#allocation52_spill] sm:$0xff] %v3781_v55 }
 0x1ae   : > { %v1756_v15 = vpop.f32.mrf.mxu2  ;;  %v3804_v63 = vpop.f32.mrf.mxu3 }
 0x1af   : > { %v3784_v22 = vadd.f32 %v1756_v15, %v1708_v23  ;;  %v1666_v10 = vpop.f32.mrf.mxu0  ;;  %v1710_v46 = vpop.f32.mrf.mxu1 }
 0x1b0   : > { %v1667_v8 = vadd.f32 %v1666_v10, %v3652_v53  ;;  %v1711_v48 = vadd.f32 %v1710_v46, %v1662_v9 }
 0x1b1   : > { %4226 = vst [vmem:[#allocation53_spill] sm:$0xff] %v3784_v22  ;;  %1861 = vmatmul.bf16.gmra.mxu0 %v3420_v38  ;;  %v2975_v22 = vld [vmem:[#allocation3 + $0x250] sm:$0xf0] }
 0x1b2   : > { %1905 = vmatmul.bf16.gmra.mxu1 %v3407_v6 }
 0x1b3   : > { %1998 = vmatmul.bf16.vlgmr.msra.gmra.mxu3 %v3378_v34  ;;  %1954 = vmatmul.bf16.gmra.mxu2 %v3590_v28 }
 0x1b6   : > { %v1759_v27 = vpop.f32.mrf.mxu2 }
 0x1b7   : > { %v3791_v60 = vadd.f32 %v1759_v27, %v1711_v48  ;;  %v1668_v17 = vpop.f32.mrf.mxu0  ;;  %v1712_v2 = vpop.f32.mrf.mxu1  ;;  %v2897_v48 = vld [vmem:[#allocation3 + $0x2f0] sm:$0xf] }
 0x1b8   : > { %v1669_v37 = vadd.f32 %v1668_v17, %v3665_v13  ;;  %v1713_v1 = vadd.f32 %v1712_v2, %v1664_v30  ;;  %v2996_v13 = vld [vmem:[#allocation3 + $0x2f8] sm:$0xf0]  ;;  %v2705_v17 = vld [vmem:[#allocation3 + $0x170] sm:$0xf] }
 0x1b9   : > { %v2898_v23 = vor.u32 %v2996_v13, %v2897_v48  ;;  %v2948_v2 = vld [vmem:[#allocation3 + $0x178] sm:$0xf0] }
 0x1bb   : > { %2137 = vmatpush.bf16.msra.mxu2 %v2898_v23 }
 0x1be   : > { %v1761_v40 = vpop.f32.mrf.mxu2 }
 0x1bf   : > { %v3794_v53 = vadd.f32 %v1761_v40, %v1713_v1  ;;  %v1671_v46 = vpop.f32.mrf.mxu0  ;;  %v1715_v12 = vpop.f32.mrf.mxu1  ;;  %v2706_v1 = vor.u32 %v2948_v2, %v2705_v17  ;;  %v2972_v40 = vld [vmem:[#allocation3 + $0x238] sm:$0xf0] }
 0x1c0   : > { %v1672_v9 = vadd.f32 %v1671_v46, %v3680_v11  ;;  %v1716_v34 = vadd.f32 %v1715_v12, %v1667_v8 }
 0x1c1   : > { %1866 = vmatmul.bf16.gmra.mxu0 %v3445_v26 }
 0x1c2   : > { %1910 = vmatmul.bf16.gmra.mxu1 %v3432_v51  ;;  %2039 = vmatpush.bf16.msra.mxu0 %v2706_v1 }
 0x1c3   : > { %2003 = vmatmul.bf16.gmra.mxu3 %v3400_v62  ;;  %1959 = vmatmul.bf16.gmra.mxu2 %v3617_v5  ;;  %v2801_v62 = vld [vmem:[#allocation3 + $0x230] sm:$0xf] }
 0x1c4   : > { %v2802_v46 = vor.u32 %v2972_v40, %v2801_v62 }
 0x1c6   : > { %v1764_v30 = vpop.f32.mrf.mxu2  ;;  %2088 = vmatpush.bf16.msra.mxu1 %v2802_v46  ;;  %v2681_v46 = vld [vmem:[#allocation3 + $0x140] sm:$0xf] }
 0x1c7   : > { %v3801_v15 = vadd.f32 %v1764_v30, %v1716_v34  ;;  %v1673_v10 = vpop.f32.mrf.mxu0  ;;  %v1717_v27 = vpop.f32.mrf.mxu1  ;;  %v2993_v30 = vld [vmem:[#allocation3 + $0x2e0] sm:$0xf0] }
 0x1c8   : > { %v1674_v11 = vadd.f32 %v1673_v10, %v3693_v19  ;;  %v1718_v8 = vadd.f32 %v1717_v27, %v1669_v37  ;;  %v2885_v37 = vld [vmem:[#allocation3 + $0x2d8] sm:$0xf] }
 0x1c9   : > { %v2886_v10 = vor.u32 %v2993_v30, %v2885_v37  ;;  %v2693_v27 = vld [vmem:[#allocation3 + $0x158] sm:$0xf]  ;;  %v2969_v37 = vld [vmem:[#allocation3 + $0x220] sm:$0xf0] }
 0x1cb   : > { %2138 = vmatpush.bf16.msra.mxu2 %v2886_v10  ;;  %v2939_v10 = vld [vmem:[#allocation3 + $0x130] sm:$0xf0] }
 0x1ce   : > { %v1766_v12 = vpop.f32.mrf.mxu2 }
 0x1cf   : > { %v3806_v48 = vadd.f32 %v1766_v12, %v1718_v8  ;;  %v1676_v13 = vpop.f32.mrf.mxu0  ;;  %v1720_v23 = vpop.f32.mrf.mxu1  ;;  %v2945_v8 = vld [vmem:[#allocation3 + $0x160] sm:$0xf0]  ;;  %v2942_v12 = vld [vmem:[#allocation3 + $0x148] sm:$0xf0] }
 0x1d0   : > { %v1677_v34 = vadd.f32 %v1676_v13, %v3708_v24  ;;  %v1721_v19 = vadd.f32 %v1720_v23, %v1672_v9  ;;  %v2694_v2 = vor.u32 %v2945_v8, %v2693_v27  ;;  %v2682_v13 = vor.u32 %v2942_v12, %v2681_v46  ;;  %v2789_v23 = vld [vmem:[#allocation3 + $0x218] sm:$0xf]  ;;  %v4227_v12 = vld [vmem:[#allocation10_spill] sm:$0xff] }
 0x1d1   : > { %1871 = vmatmul.bf16.gmra.mxu0 %v3472_v31  ;;  %v2790_v30 = vor.u32 %v2969_v37, %v2789_v23  ;;  %v2645_v37 = vld [vmem:[#allocation3 + $0xf8] sm:$0xf] }
 0x1d2   : > { %1915 = vmatmul.bf16.gmra.mxu1 %v3459_v50  ;;  %2040 = vmatpush.bf16.msra.mxu0 %v2694_v2 }
 0x1d3   : > { %2008 = vmatmul.bf16.gmra.mxu3 %v3424_v41  ;;  %1964 = vmatmul.bf16.gmra.mxu2 %v3643_v47  ;;  %v3816_v41 = vpop.f32.mrf.mxu3 }
 0x1d4   : > { %2089 = vmatpush.bf16.msra.mxu1 %v2790_v30  ;;  %v2933_v30 = vld [vmem:[#allocation3 + $0x100] sm:$0xf0] }
 0x1d6   : > { %v1769_v17 = vpop.f32.mrf.mxu2  ;;  %2041 = vmatpush.bf16.msra.mxu0 %v2682_v13  ;;  %v4228_v13 = vld [vmem:[#allocation33_spill] sm:$0xff] }
 0x1d7   : > { %v3813_v1 = vadd.f32 %v1769_v17, %v1721_v19  ;;  %v1678_v24 = vpop.f32.mrf.mxu0  ;;  %v1722_v62 = vpop.f32.mrf.mxu1  ;;  %v2670_v19 = vor.u32 %v2939_v10, %v2669_v35  ;;  %v2873_v35 = vld [vmem:[#allocation3 + $0x2c0] sm:$0xf]  ;;  %v2646_v10 = vor.u32 %v2933_v30, %v2645_v37  ;;  %v2963_v30 = vld [vmem:[#allocation3 + $0x1f0] sm:$0xf0] }
 0x1d8   : > { %v1679_v9 = vadd.f32 %v1678_v24, %v3721_v33  ;;  %v1723_v40 = vadd.f32 %v1722_v62, %v1674_v11  ;;  %v2657_v11 = vld [vmem:[#allocation3 + $0x110] sm:$0xf]  ;;  %v2936_v24 = vld [vmem:[#allocation3 + $0x118] sm:$0xf0] }
 0x1d9   : > { %v2658_v62 = vor.u32 %v2936_v24, %v2657_v11  ;;  %v2777_v11 = vld [vmem:[#allocation3 + $0x200] sm:$0xf]  ;;  %v2966_v24 = vld [vmem:[#allocation3 + $0x208] sm:$0xf0] }
 0x1da   : > { %2042 = vmatpush.bf16.msra.mxu0 %v2670_v19  ;;  %v2778_v61 = vor.u32 %v2966_v24, %v2777_v11 }
 0x1db   : > { %v3824_v46 = vpop.f32.mrf.mxu3 }
 0x1dc   : > { %2090 = vmatpush.bf16.msra.mxu1 %v2778_v61  ;;  %v2753_v61 = vld [vmem:[#allocation3 + $0x1d0] sm:$0xf] }
 0x1de   : > { %v1771_v27 = vpop.f32.mrf.mxu2  ;;  %2043 = vmatpush.bf16.msra.mxu0 %v2658_v62 }
 0x1df   : > { %v3818_v8 = vadd.f32 %v1771_v27, %v1723_v40  ;;  %v3820_v33 = vpop.f32.mrf.mxu0  ;;  %v1725_v17 = vpop.f32.mrf.mxu1  ;;  %v2990_v40 = vld [vmem:[#allocation3 + $0x2c8] sm:$0xf0] }
 0x1e0   : > { %v1726_v2 = vadd.f32 %v1725_v17, %v1677_v34  ;;  %v2874_v23 = vor.u32 %v2990_v40, %v2873_v35  ;;  %v2621_v35 = vld [vmem:[#allocation3 + $0xc8] sm:$0xf]  ;;  %v2927_v40 = vld [vmem:[#allocation3 + $0xd0] sm:$0xf0] }
 0x1e1   : > { %1876 = vmatmul.bf16.gmra.mxu0 %v3499_v18  ;;  %v2622_v37 = vor.u32 %v2927_v40, %v2621_v35  ;;  %v2984_v35 = vld [vmem:[#allocation3 + $0x298] sm:$0xf0]  ;;  %v2951_v18 = vld [vmem:[#allocation3 + $0x190] sm:$0xf0] }
 0x1e2   : > { %1920 = vmatmul.bf16.gmra.mxu1 %v4227_v12  ;;  %2139 = vmatpush.bf16.msra.mxu2 %v2874_v23  ;;  %v2765_v23 = vld [vmem:[#allocation3 + $0x1e8] sm:$0xf]  ;;  %v4229_v40 = vld [vmem:[#allocation12_spill] sm:$0xff] }
 0x1e3   : > { %2013 = vmatmul.bf16.gmra.mxu3 %v3449_v29  ;;  %1969 = vmatmul.bf16.gmra.mxu2 %v4228_v13  ;;  %v3832_v62 = vpop.f32.mrf.mxu3  ;;  %v2987_v13 = vld [vmem:[#allocation3 + $0x2b0] sm:$0xf0] }
 0x1e4   : > { %2044 = vmatpush.bf16.msra.mxu0 %v2646_v10 }
 0x1e6   : > { %v1774_v34 = vpop.f32.mrf.mxu2 }
 0x1e7   : > { %v3828_v27 = vadd.f32 %v1774_v34, %v1726_v2  ;;  %v3830_v19 = vpop.f32.mrf.mxu0  ;;  %v1727_v29 = vpop.f32.mrf.mxu1  ;;  %v2861_v34 = vld [vmem:[#allocation3 + $0x2a8] sm:$0xf] }
 0x1e8   : > { %v1728_v17 = vadd.f32 %v1727_v29, %v1679_v9  ;;  %2045 = vmatpush.bf16.msra.mxu0 %v2634_v57  ;;  %v2766_v29 = vor.u32 %v2963_v30, %v2765_v23  ;;  %v2862_v43 = vor.u32 %v2987_v13, %v2861_v34  ;;  %v2960_v57 = vld [vmem:[#allocation3 + $0x1d8] sm:$0xf0]  ;;  %v2850_v23 = vor.u32 %v2984_v35, %v2849_v4  ;;  %v2957_v13 = vld [vmem:[#allocation3 + $0x1c0] sm:$0xf0] }
 0x1e9   : > { %v2754_v24 = vor.u32 %v2960_v57, %v2753_v61  ;;  %v2729_v57 = vld [vmem:[#allocation3 + $0x1a0] sm:$0xf] }
 0x1ea   : > { %2091 = vmatpush.bf16.msra.mxu1 %v2766_v29  ;;  %2140 = vmatpush.bf16.msra.mxu2 %v2862_v43  ;;  %v2981_v29 = vld [vmem:[#allocation3 + $0x280] sm:$0xf0]  ;;  %v2825_v43 = vld [vmem:[#allocation3 + $0x260] sm:$0xf] }
 0x1eb   : > { %v3846_v12 = vpop.f32.mrf.mxu3 }
 0x1ec   : > { %2046 = vmatpush.bf16.msra.mxu0 %v2622_v37  ;;  %v2837_v37 = vld [vmem:[#allocation3 + $0x278] sm:$0xf] }
 0x1ed   : > { %v2838_v61 = vor.u32 %v2981_v29, %v2837_v37  ;;  %v4231_v29 = vld [vmem:[#allocation14_spill] sm:$0xff] }
 0x1ee   : > { %v1776_v2 = vpop.f32.mrf.mxu2  ;;  %2092 = vmatpush.bf16.msra.mxu1 %v2754_v24  ;;  %2141 = vmatpush.bf16.msra.mxu2 %v2850_v23  ;;  %v2978_v24 = vld [vmem:[#allocation3 + $0x268] sm:$0xf0] }
 0x1ef   : > { %v3834_v10 = vadd.f32 %v1776_v2, %v1728_v17  ;;  %v3836_v9 = vpop.f32.mrf.mxu0  ;;  %v3838_v11 = vpop.f32.mrf.mxu1  ;;  %v4230_v17 = vld [vmem:[#allocation38_spill] sm:$0xff]  ;;  %v2741_v2 = vld [vmem:[#allocation3 + $0x1b8] sm:$0xf]  ;;  %v2826_v35 = vor.u32 %v2978_v24, %v2825_v43 }
 0x1f0   : > { %v2742_v34 = vor.u32 %v2957_v13, %v2741_v2  ;;  %v2813_v2 = vld [vmem:[#allocation3 + $0x248] sm:$0xf] }
 0x1f1   : > { %1881 = vmatmul.bf16.gmra.mxu0 %v3524_v45  ;;  %v2814_v23 = vor.u32 %v2975_v22, %v2813_v2  ;;  %v1804_v22 = vadd.f32 %v3816_v41, %v4231_v29  ;;  %v1645_v29 = vadd.f32 %v3804_v63, %v3738_v52 }
 0x1f2   : > { %1925 = vmatmul.bf16.gmra.mxu1 %v4229_v40  ;;  %2142 = vmatpush.bf16.msra.mxu2 %v2838_v61  ;;  %v2717_v40 = vld [vmem:[#allocation3 + $0x188] sm:$0xf] }
 0x1f3   : > { %2018 = vmatmul.bf16.gmra.mxu3 %v3476_v39  ;;  %1974 = vmatmul.bf16.gmra.mxu2 %v4230_v17  ;;  %v2954_v17 = vld [vmem:[#allocation3 + $0x1a8] sm:$0xf0]  ;;  %v2718_v55 = vor.u32 %v2951_v18, %v2717_v40  ;;  %v3852_v37 = vpop.f32.mrf.mxu3 }
 0x1f4   : > { %2093 = vmatpush.bf16.msra.mxu1 %v2742_v34  ;;  %v2730_v4 = vor.u32 %v2954_v17, %v2729_v57 }
 0x1f6   : > { %v3844_v30 = vpop.f32.mrf.mxu2  ;;  %2143 = vmatpush.bf16.msra.mxu2 %v2826_v35 }
 0x1f7   : > { %v1688_v45 = vpop.f32.mrf.mxu0  ;;  %v3848_v39 = vpop.f32.mrf.mxu1 }
 0x1f8   : > { %2094 = vmatpush.bf16.msra.mxu1 %v2730_v4  ;;  %v4232_v4 = vld [vmem:[#allocation17_spill] sm:$0xff]  ;;  %v1689_v52 = vadd.f32 %v1688_v45, %v3771_v54 }
 0x1f9   : > { %v1806_v24 = vadd.f32 %v3824_v46, %v4232_v4  ;;  %v4234_v54 = vld [vmem:[#allocation21_spill] sm:$0xff] }
 0x1fa   : > { %2144 = vmatpush.bf16.msra.mxu2 %v2814_v23 }
 0x1fb   : > { %v3858_v40 = vpop.f32.mrf.mxu3 }
 0x1fc   : > { %2095 = vmatpush.bf16.msra.mxu1 %v2718_v55 }
 0x1fe   : > { %v3850_v13 = vpop.f32.mrf.mxu2 }
 0x1ff   : > { %v1691_v47 = vpop.f32.mrf.mxu0  ;;  %v1735_v50 = vpop.f32.mrf.mxu1 }
 0x201   : > { %1886 = vmatmul.bf16.gmra.mxu0 %v3557_v14 }
 0x202   : > { %1930 = vmatmul.bf16.gmra.mxu1 %v3537_v0 }
 0x203   : > { %2023 = vmatmul.bf16.gmra.mxu3 %v3503_v21  ;;  %1979 = vmatmul.bf16.gmra.mxu2 %v3727_v7  ;;  %v3866_v21 = vpop.f32.mrf.mxu3 }
 0x206   : > { %v1784_v17 = vpop.f32.mrf.mxu2 }
 0x207   : > { %v1693_v34 = vpop.f32.mrf.mxu0  ;;  %v1737_v18 = vpop.f32.mrf.mxu1 }
 0x20e   : > { %v1786_v61 = vpop.f32.mrf.mxu2 }
 0x20f   : > { %v1852_v57 = vpop.f32.mrf.mxu0  ;;  %v1740_v55 = vpop.f32.mrf.mxu1 }
 0x210   : > { %v1853_v43 = vadd.f32 %v1852_v57, %v1804_v22  ;;  %v1694_v22 = vadd.f32 %v1693_v34, %v1645_v29  ;;  %v1738_v29 = vadd.f32 %v1737_v18, %v1689_v52  ;;  %v1811_v18 = vadd.f32 %v3846_v12, %v4234_v54 }
 0x211   : > { %2047 = vmatmul.bf16.vlgmr.msra.gmra.mxu0 %v3374_v32  ;;  %v3876_v32 = vld [vmem:[%s4161_s6] sm:$0x7]  ;;  %v1682_v12 = vadd.f32 %v3820_v33, %v3736_v25 }
 0x212   : > { %1935 = vmatmul.bf16.gmra.mxu1 %v3570_v56  ;;  %v4233_v56 = vld [vmem:[#allocation19_spill] sm:$0xff]  ;;  %v3881_v7 = vperm.slane %v3876_v32, 0 }
 0x213   : > { %2028 = vmatmul.bf16.gmra.mxu3 %v3526_v49  ;;  %1984 = vmatmul.bf16.gmra.mxu2 %v3754_v20  ;;  %v1692_v49 = vadd.f32 %v1691_v47, %v3779_v3  ;;  %v1809_v46 = vadd.f32 %v3832_v62, %v4233_v56  ;;  %v1687_v56 = vadd.f32 %v3836_v9, %v3763_v36 }
 0x214   : > { %v1787_v62 = vadd.f32 %v1786_v61, %v1738_v29 }
 0x215   : > { %v1741_v57 = vadd.f32 %v1740_v55, %v1692_v49 }
 0x216   : > { %v1789_v35 = vpop.f32.mrf.mxu2  ;;  %v2233_v36 = vadd.f32 %v3881_v7, %v1787_v62 }
 0x217   : > { %v1854_v2 = vpop.f32.mrf.mxu0  ;;  %v1742_v41 = vpop.f32.mrf.mxu1  ;;  %v1790_v47 = vadd.f32 %v1789_v35, %v1741_v57 }
 0x218   : > { %v1855_v23 = vadd.f32 %v1854_v2, %v1806_v24  ;;  %v1743_v20 = vadd.f32 %v1742_v41, %v1694_v22  ;;  %v3883_v24 = vpop.f32.mrf.mxu3 }
 0x219   : > { %v2236_v49 = vadd.f32 %v3881_v7, %v1790_v47 }
 0x21b   : > { %v2284_v9 = vmax.f32 %v2236_v49, 0.0 }
 0x21e   : > { %v1791_v4 = vpop.f32.mrf.mxu2 }
 0x21f   : > { %v1792_v63 = vadd.f32 %v1791_v4, %v1743_v20  ;;  %v1857_v3 = vpop.f32.mrf.mxu0  ;;  %v1901_v2 = vpop.f32.mrf.mxu1  ;;  %v1736_v20 = vadd.f32 %v1735_v50, %v1687_v56  ;;  %v4235_v4 = vld [vmem:[#allocation23_spill] sm:$0xff] }
 0x220   : > { %v1858_v34 = vadd.f32 %v1857_v3, %v1809_v46  ;;  %v1902_v41 = vadd.f32 %v1901_v2, %v1853_v43  ;;  %v3901_v57 = vpop.f32.mrf.mxu3  ;;  %v1731_v46 = vadd.f32 %v3838_v11, %v1682_v12  ;;  %v1814_v52 = vadd.f32 %v3852_v37, %v4235_v4  ;;  %v4236_v37 = vld [vmem:[#allocation25_spill] sm:$0xff] }
 0x221   : > { %v2239_v55 = vadd.f32 %v3881_v7, %v1792_v63  ;;  %2052 = vmatmul.bf16.gmra.mxu0 %v3398_v59  ;;  %v1785_v43 = vadd.f32 %v1784_v17, %v1736_v20  ;;  %v2281_v17 = vmax.f32 %v2233_v36, 0.0  ;;  %v2203_v4 = vadd.f32 %v3881_v7, %v3794_v53 }
 0x222   : > { %2096 = vmatmul.bf16.vlgmr.msra.gmra.mxu1 %v3383_v42  ;;  %v1780_v63 = vadd.f32 %v3844_v30, %v1731_v46 }
 0x223   : > { %2033 = vmatmul.bf16.gmra.mxu3 %v3562_v58  ;;  %v2287_v45 = vmax.f32 %v2239_v55, 0.0  ;;  %2145 = vmatmul.bf16.vlgmr.msra.gmra.mxu2 %v3564_v16  ;;  %v1684_v58 = vadd.f32 %v3830_v19, %v3749_v44  ;;  %v2230_v19 = vadd.f32 %v3881_v7, %v1785_v43  ;;  %v1816_v55 = vadd.f32 %v3858_v40, %v4236_v37  ;;  %v4237_v40 = vld [vmem:[#allocation27_spill] sm:$0xff] }
 0x224   : > { %v2224_v11 = vadd.f32 %v3881_v7, %v1780_v63 }
 0x225   : > { %2293 = vmatpush.xpose.msrb.mxu3 %v2287_v45  ;;  %v1733_v50 = vadd.f32 %v3848_v39, %v1684_v58 }
 0x226   : > { %v1950_v59 = vpop.f32.mrf.mxu2  ;;  %v2272_v56 = vmax.f32 %v2224_v11, 0.0 }
 0x227   : > { %v3899_v61 = vadd.f32 %v1950_v59, %v1902_v41  ;;  %v1859_v35 = vpop.f32.mrf.mxu0  ;;  %v1903_v42 = vpop.f32.mrf.mxu1  ;;  %v1782_v44 = vadd.f32 %v3850_v13, %v1733_v50 }
 0x228   : > { %v1860_v22 = vadd.f32 %v1859_v35, %v1811_v18  ;;  %v1904_v16 = vadd.f32 %v1903_v42, %v1855_v23  ;;  %v2278_v23 = vmax.f32 %v2230_v19, 0.0  ;;  %v3917_v29 = vpop.f32.mrf.mxu3  ;;  %v1819_v18 = vadd.f32 %v3866_v21, %v4237_v40  ;;  %v4243_v40 = vld [vmem:[#allocation32_spill] sm:$0xff] }
 0x229   : > { %2294 = vmatpush.xpose.msrb.mxu3 %v2284_v9  ;;  %v2227_v39 = vadd.f32 %v3881_v7, %v1782_v44 }
 0x22b   : > { %v2275_v30 = vmax.f32 %v2227_v39, 0.0 }
 0x22d   : > { %2295 = vmatpush.xpose.msrb.mxu3 %v2281_v17 }
 0x22e   : > { %v1952_v47 = vpop.f32.mrf.mxu2 }
 0x22f   : > { %v3913_v3 = vadd.f32 %v1952_v47, %v1904_v16  ;;  %v1862_v25 = vpop.f32.mrf.mxu0  ;;  %v1906_v13 = vpop.f32.mrf.mxu1  ;;  %v2209_v16 = vadd.f32 %v3881_v7, %v3806_v48 }
 0x230   : > { %v1863_v33 = vadd.f32 %v1862_v25, %v1814_v52  ;;  %v1907_v2 = vadd.f32 %v1906_v13, %v1858_v34  ;;  %v2221_v34 = vadd.f32 %v3881_v7, %v3834_v10  ;;  %v3929_v54 = vpop.f32.mrf.mxu3  ;;  %v2215_v10 = vadd.f32 %v3881_v7, %v3818_v8  ;;  %v4238_v8 = vld [vmem:[#allocation30_spill] sm:$0xff]  ;;  %v4239_v25 = vld [vmem:[#allocation9_spill] sm:$0xff] }
 0x231   : > { %2296 = vmatpush.xpose.msrb.mxu3 %v2278_v23  ;;  %2057 = vmatmul.bf16.gmra.mxu0 %v3420_v38  ;;  %v1821_v42 = vadd.f32 %v3883_v24, %v4238_v8  ;;  %v2257_v46 = vmax.f32 %v2209_v16, 0.0  ;;  %v2251_v13 = vmax.f32 %v2203_v4, 0.0 }
 0x232   : > { %2101 = vmatmul.bf16.gmra.mxu1 %v3407_v6  ;;  %v2218_v6 = vadd.f32 %v3881_v7, %v3828_v27  ;;  %v2212_v27 = vadd.f32 %v3881_v7, %v3813_v1  ;;  %v2263_v21 = vmax.f32 %v2215_v10, 0.0 }
 0x233   : > { %2150 = vmatmul.bf16.gmra.mxu2 %v3590_v28  ;;  %v2269_v28 = vmax.f32 %v2221_v34, 0.0 }
 0x234   : > { %v2266_v59 = vmax.f32 %v2218_v6, 0.0  ;;  %v2260_v12 = vmax.f32 %v2212_v27, 0.0 }
 0x235   : > { %2297 = vmatpush.xpose.msrb.mxu3 %v2275_v30 }
 0x236   : > { %v1955_v41 = vpop.f32.mrf.mxu2 }
 0x237   : > { %v3925_v62 = vadd.f32 %v1955_v41, %v1907_v2  ;;  %v1864_v38 = vpop.f32.mrf.mxu0  ;;  %v1908_v45 = vpop.f32.mrf.mxu1  ;;  %v4241_v2 = vld [vmem:[#allocation53_spill] sm:$0xff] }
 0x238   : > { %v1865_v49 = vadd.f32 %v1864_v38, %v1816_v55  ;;  %v1909_v20 = vadd.f32 %v1908_v45, %v1860_v22  ;;  %v3946_v44 = vpop.f32.mrf.mxu3  ;;  %v2197_v11 = vadd.f32 %v3881_v7, %v4241_v2 }
 0x239   : > { %2298 = vmatpush.xpose.msrb.mxu3 %v2272_v56 }
 0x23a   : > { %v2245_v38 = vmax.f32 %v2197_v11, 0.0  ;;  %v4252_v11 = vld [vmem:[#allocation16_spill] sm:$0xff] }
 0x23d   : > { %2299 = vmatpush.xpose.msrb.mxu3 %v2269_v28 }
 0x23e   : > { %v1957_v58 = vpop.f32.mrf.mxu2 }
 0x23f   : > { %v3935_v43 = vadd.f32 %v1957_v58, %v1909_v20  ;;  %v1867_v36 = vpop.f32.mrf.mxu0  ;;  %v1911_v35 = vpop.f32.mrf.mxu1  ;;  %v4244_v58 = vld [vmem:[#allocation11_spill] sm:$0xff] }
 0x240   : > { %v1868_v9 = vadd.f32 %v1867_v36, %v1819_v18  ;;  %v1912_v22 = vadd.f32 %v1911_v35, %v1863_v33  ;;  %v3956_v39 = vpop.f32.mrf.mxu3  ;;  %v4240_v33 = vld [vmem:[#allocation28_spill] sm:$0xff]  ;;  %v1824_v18 = vadd.f32 %v3901_v57, %v4243_v40  ;;  %v4247_v36 = vld [vmem:[#allocation35_spill] sm:$0xff] }
 0x241   : > { %2300 = vmatpush.xpose.msrb.mxu3 %v2266_v59  ;;  %2062 = vmatmul.bf16.gmra.mxu0 %v3445_v26  ;;  %v4245_v59 = vld [vmem:[#allocation10_spill] sm:$0xff] }
 0x242   : > { %2106 = vmatmul.bf16.gmra.mxu1 %v3432_v51 }
 0x243   : > { %2155 = vmatmul.bf16.gmra.mxu2 %v3617_v5  ;;  %v2206_v5 = vadd.f32 %v3881_v7, %v3801_v15  ;;  %v2200_v15 = vadd.f32 %v3881_v7, %v3791_v60 }
 0x245   : > { %2301 = vmatpush.xpose.msrb.mxu3 %v2263_v21  ;;  %v2254_v48 = vmax.f32 %v2206_v5, 0.0  ;;  %v2248_v30 = vmax.f32 %v2200_v15, 0.0  ;;  %v4250_v5 = vld [vmem:[#allocation38_spill] sm:$0xff] }
 0x246   : > { %v1960_v50 = vpop.f32.mrf.mxu2 }
 0x247   : > { %v3948_v26 = vadd.f32 %v1960_v50, %v1912_v22  ;;  %v1869_v19 = vpop.f32.mrf.mxu0  ;;  %v1913_v17 = vpop.f32.mrf.mxu1 }
 0x248   : > { %v1870_v1 = vadd.f32 %v1869_v19, %v1821_v42  ;;  %v1914_v51 = vadd.f32 %v1913_v17, %v1865_v49  ;;  %v3969_v56 = vpop.f32.mrf.mxu3 }
 0x249   : > { %2302 = vmatpush.xpose.msrb.mxu3 %v2260_v12 }
 0x24d   : > { %2303 = vmatpush.xpose.msrb.mxu3 %v2257_v46 }
 0x24e   : > { %v1962_v24 = vpop.f32.mrf.mxu2 }
 0x24f   : > { %v3954_v52 = vadd.f32 %v1962_v24, %v1914_v51  ;;  %v1872_v47 = vpop.f32.mrf.mxu0  ;;  %v1916_v63 = vpop.f32.mrf.mxu1  ;;  %v4248_v51 = vld [vmem:[#allocation13_spill] sm:$0xff] }
 0x250   : > { %v1917_v23 = vadd.f32 %v1916_v63, %v1868_v9  ;;  %v1873_v10 = vadd.f32 %v1872_v47, %v1824_v18  ;;  %v1826_v9 = vadd.f32 %v3917_v29, %v4247_v36  ;;  %v1838_v35 = vpop.f32.mrf.mxu3  ;;  %v4249_v29 = vld [vmem:[#allocation12_spill] sm:$0xff] }
 0x251   : > { %2304 = vmatpush.xpose.msrb.mxu3 %v2254_v48  ;;  %2067 = vmatmul.bf16.gmra.mxu0 %v3472_v31  ;;  %v4242_v31 = vld [vmem:[#allocation52_spill] sm:$0xff] }
 0x252   : > { %2111 = vmatmul.bf16.gmra.mxu1 %v4239_v25  ;;  %v2194_v60 = vadd.f32 %v3881_v7, %v4242_v31  ;;  %v4246_v7 = vld [vmem:[#allocation33_spill] sm:$0xff]  ;;  %v4251_v25 = vld [vmem:[#allocation43_spill] sm:$0xff] }
 0x253   : > { %2160 = vmatmul.bf16.gmra.mxu2 %v4240_v33 }
 0x254   : > { %v2242_v45 = vmax.f32 %v2194_v60, 0.0  ;;  %v4253_v60 = vld [vmem:[#allocation15_spill] sm:$0xff] }
 0x255   : > { %2305 = vmatpush.xpose.msrb.mxu3 %v2251_v13 }
 0x256   : > { %v1965_v53 = vpop.f32.mrf.mxu2 }
 0x257   : > { %v3965_v37 = vadd.f32 %v1965_v53, %v1917_v23  ;;  %v1874_v55 = vpop.f32.mrf.mxu0  ;;  %v1918_v41 = vpop.f32.mrf.mxu1 }
 0x258   : > { %v1919_v34 = vadd.f32 %v1918_v41, %v1870_v1  ;;  %v1875_v21 = vadd.f32 %v1874_v55, %v1826_v9  ;;  %v1840_v12 = vpop.f32.mrf.mxu3 }
 0x259   : > { %2306 = vmatpush.xpose.msrb.mxu3 %v2248_v30 }
 0x25d   : > { %2307 = vmatpush.xpose.msrb.mxu3 %v2245_v38  ;;  %v4254_v38 = vld [vmem:[#allocation48_spill] sm:$0xff] }
 0x25e   : > { %v1967_v49 = vpop.f32.mrf.mxu2 }
 0x25f   : > { %v3971_v20 = vadd.f32 %v1967_v49, %v1919_v34  ;;  %v3973_v6 = vpop.f32.mrf.mxu0  ;;  %v1921_v28 = vpop.f32.mrf.mxu1 }
 0x260   : > { %v1922_v22 = vadd.f32 %v1921_v28, %v1873_v10  ;;  %v1999_v48 = vpop.f32.mrf.mxu3 }
 0x261   : > { %2308 = vmatpush.xpose.msrb.mxu3 %v2242_v45  ;;  %2072 = vmatmul.bf16.gmra.mxu0 %v4244_v58  ;;  %v2000_v30 = vadd.f32 %v1999_v48, %v4252_v11  ;;  %v4256_v58 = vld [vmem:[#allocation47_spill] sm:$0xff] }
 0x262   : > { %2116 = vmatmul.bf16.gmra.mxu1 %v4245_v59  ;;  %v1839_v10 = vadd.f32 %v1838_v35, %v4256_v58  ;;  %v4257_v59 = vld [vmem:[#allocation50_spill] sm:$0xff] }
 0x263   : > { %2165 = vmatmul.bf16.gmra.mxu2 %v4246_v7  ;;  %v1841_v7 = vadd.f32 %v1840_v12, %v4257_v59  ;;  %v4260_v12 = vld [vmem:[#allocation42_spill] sm:$0xff] }
 0x266   : > { %v1970_v27 = vpop.f32.mrf.mxu2 }
 0x267   : > { %v3982_v8 = vadd.f32 %v1970_v27, %v1922_v22  ;;  %v3984_v42 = vpop.f32.mrf.mxu0  ;;  %v1923_v57 = vpop.f32.mrf.mxu1  ;;  %v4258_v22 = vld [vmem:[#allocation45_spill] sm:$0xff] }
 0x268   : > { %v1924_v50 = vadd.f32 %v1923_v57, %v1875_v21  ;;  %v2001_v15 = vpop.f32.mrf.mxu3  ;;  %v1836_v27 = vadd.f32 %v3969_v56, %v4258_v22 }
 0x26e   : > { %v1972_v16 = vpop.f32.mrf.mxu2 }
 0x26f   : > { %v3986_v19 = vadd.f32 %v1972_v16, %v1924_v50  ;;  %v1882_v1 = vpop.f32.mrf.mxu0  ;;  %v3988_v17 = vpop.f32.mrf.mxu1  ;;  %v4259_v50 = vld [vmem:[#allocation20_spill] sm:$0xff] }
 0x270   : > { %v2004_v2 = vpop.f32.mrf.mxu3 }
 0x271   : > { %2077 = vmatmul.bf16.gmra.mxu0 %v4248_v51  ;;  %v2005_v16 = vadd.f32 %v2004_v2, %v4259_v50 }
 0x272   : > { %2121 = vmatmul.bf16.gmra.mxu1 %v4249_v29  ;;  %v4012_v29 = vperm.slane %v3876_v32, 1 }
 0x273   : > { %2170 = vmatmul.bf16.gmra.mxu2 %v4250_v5 }
 0x276   : > { %v3993_v46 = vpop.f32.mrf.mxu2 }
 0x277   : > { %v1884_v24 = vpop.f32.mrf.mxu0  ;;  %v3995_v4 = vpop.f32.mrf.mxu1 }
 0x278   : > { %v1885_v5 = vadd.f32 %v1884_v24, %v1836_v27 }
 0x27e   : > { %v3997_v47 = vpop.f32.mrf.mxu2 }
 0x27f   : > { %v1887_v63 = vpop.f32.mrf.mxu0  ;;  %v1931_v23 = vpop.f32.mrf.mxu1 }
 0x280   : > { %v1888_v36 = vadd.f32 %v1887_v63, %v1839_v10  ;;  %v1834_v63 = vadd.f32 %v3956_v39, %v4260_v12 }
 0x281   : > { %2082 = vmatmul.bf16.gmra.mxu0 %v3557_v14  ;;  %v4255_v14 = vld [vmem:[#allocation18_spill] sm:$0xff] }
 0x282   : > { %2126 = vmatmul.bf16.gmra.mxu1 %v3537_v0  ;;  %v2002_v49 = vadd.f32 %v2001_v15, %v4255_v14  ;;  %v2006_v0 = vpop.f32.mrf.mxu3  ;;  %v4261_v14 = vld [vmem:[#allocation40_spill] sm:$0xff] }
 0x283   : > { %2175 = vmatmul.bf16.gmra.mxu2 %v4251_v25  ;;  %v1831_v24 = vadd.f32 %v3946_v44, %v4261_v14 }
 0x286   : > { %v1980_v33 = vpop.f32.mrf.mxu2 }
 0x287   : > { %v1889_v13 = vpop.f32.mrf.mxu0  ;;  %v1933_v53 = vpop.f32.mrf.mxu1 }
 0x288   : > { %v1890_v9 = vadd.f32 %v1889_v13, %v1841_v7  ;;  %v4263_v7 = vld [vmem:[#allocation37_spill] sm:$0xff] }
 0x28a   : > { %v2009_v13 = vpop.f32.mrf.mxu3 }
 0x28e   : > { %v1982_v55 = vpop.f32.mrf.mxu2 }
 0x28f   : > { %v2048_v41 = vpop.f32.mrf.mxu0  ;;  %v1936_v34 = vpop.f32.mrf.mxu1 }
 0x290   : > { %v2049_v31 = vadd.f32 %v2048_v41, %v2000_v30  ;;  %v1937_v21 = vadd.f32 %v1936_v34, %v1888_v36  ;;  %v1934_v30 = vadd.f32 %v1933_v53, %v1885_v5  ;;  %v1883_v34 = vadd.f32 %v1882_v1, %v1834_v63 }
 0x291   : > { %v1829_v36 = vadd.f32 %v3929_v54, %v4263_v7 }
 0x292   : > { %2131 = vmatmul.bf16.gmra.mxu1 %v4253_v60  ;;  %v1983_v2 = vadd.f32 %v1982_v55, %v1934_v30 }
 0x293   : > { %2180 = vmatmul.bf16.gmra.mxu2 %v4254_v38 }
 0x294   : > { %v2234_v53 = vadd.f32 %v4012_v29, %v1983_v2 }
 0x296   : > { %v1985_v45 = vpop.f32.mrf.mxu2  ;;  %v2282_v22 = vmax.f32 %v2234_v53, 0.0 }
 0x297   : > { %v2050_v28 = vpop.f32.mrf.mxu0  ;;  %v1938_v40 = vpop.f32.mrf.mxu1  ;;  %v1986_v48 = vadd.f32 %v1985_v45, %v1937_v21  ;;  %v4262_v45 = vld [vmem:[#allocation22_spill] sm:$0xff]  ;;  %v4264_v21 = vld [vmem:[#allocation24_spill] sm:$0xff] }
 0x298   : > { %v2051_v18 = vadd.f32 %v2050_v28, %v2002_v49  ;;  %v1939_v57 = vadd.f32 %v1938_v40, %v1890_v9  ;;  %v1932_v49 = vadd.f32 %v1931_v23, %v1883_v34  ;;  %v2007_v28 = vadd.f32 %v2006_v0, %v4262_v45  ;;  %v2011_v0 = vpop.f32.mrf.mxu3 }
 0x299   : > { %v2237_v60 = vadd.f32 %v4012_v29, %v1986_v48  ;;  %v1880_v40 = vadd.f32 %v3984_v42, %v1831_v24  ;;  %v1878_v42 = vadd.f32 %v3973_v6, %v1829_v36  ;;  %v2216_v24 = vadd.f32 %v4012_v29, %v3971_v20 }
 0x29a   : > { %v1981_v58 = vadd.f32 %v1980_v33, %v1932_v49  ;;  %v2210_v20 = vadd.f32 %v4012_v29, %v3954_v52  ;;  %v2204_v52 = vadd.f32 %v4012_v29, %v3935_v43  ;;  %v2198_v43 = vadd.f32 %v4012_v29, %v3913_v3 }
 0x29b   : > { %v2285_v10 = vmax.f32 %v2237_v60, 0.0  ;;  %v1929_v44 = vadd.f32 %v3995_v4, %v1880_v40  ;;  %v1927_v27 = vadd.f32 %v3988_v17, %v1878_v42  ;;  %v4266_v60 = vld [vmem:[#allocation29_spill] sm:$0xff]  ;;  %v2264_v53 = vmax.f32 %v2216_v24, 0.0 }
 0x29c   : > { %v2231_v9 = vadd.f32 %v4012_v29, %v1981_v58 }
 0x29d   : > { %v1978_v33 = vadd.f32 %v3997_v47, %v1929_v44  ;;  %v1976_v54 = vadd.f32 %v3993_v46, %v1927_v27  ;;  %v2222_v46 = vadd.f32 %v4012_v29, %v3986_v19 }
 0x29e   : > { %v1987_v51 = vpop.f32.mrf.mxu2 }
 0x29f   : > { %v1988_v15 = vadd.f32 %v1987_v51, %v1939_v57  ;;  %v2053_v25 = vpop.f32.mrf.mxu0  ;;  %v2097_v11 = vpop.f32.mrf.mxu1  ;;  %v2010_v57 = vadd.f32 %v2009_v13, %v4264_v21  ;;  %v2228_v4 = vadd.f32 %v4012_v29, %v1978_v33  ;;  %v2225_v48 = vadd.f32 %v4012_v29, %v1976_v54 }
 0x2a0   : > { %v2054_v35 = vadd.f32 %v2053_v25, %v2005_v16  ;;  %v2098_v41 = vadd.f32 %v2097_v11, %v2049_v31  ;;  %v2014_v17 = vpop.f32.mrf.mxu3  ;;  %v4265_v25 = vld [vmem:[#allocation26_spill] sm:$0xff]  ;;  %v2270_v2 = vmax.f32 %v2222_v46, 0.0  ;;  %v2258_v33 = vmax.f32 %v2210_v20, 0.0 }
 0x2a1   : > { %v2240_v56 = vadd.f32 %v4012_v29, %v1988_v15  ;;  %v2276_v15 = vmax.f32 %v2228_v4, 0.0  ;;  %v2012_v11 = vadd.f32 %v2011_v0, %v4265_v25  ;;  %v2273_v63 = vmax.f32 %v2225_v48, 0.0 }
 0x2a3   : > { %v2288_v38 = vmax.f32 %v2240_v56, 0.0 }
 0x2a5   : > { %2313 = vmatpush.xpose.msra.mxu3 %v2288_v38  ;;  %v2015_v38 = vadd.f32 %v2014_v17, %v4266_v60 }
 0x2a6   : > { %v2146_v39 = vpop.f32.mrf.mxu2 }
 0x2a7   : > { %v4023_v31 = vadd.f32 %v2146_v39, %v2098_v41  ;;  %v2055_v1 = vpop.f32.mrf.mxu0  ;;  %v2099_v59 = vpop.f32.mrf.mxu1 }
 0x2a8   : > { %v2056_v55 = vadd.f32 %v2055_v1, %v2007_v28  ;;  %v2100_v23 = vadd.f32 %v2099_v59, %v2051_v18  ;;  %v2279_v18 = vmax.f32 %v2231_v9, 0.0  ;;  %v2016_v49 = vpop.f32.mrf.mxu3  ;;  %v4268_v9 = vld [vmem:[#allocation34_spill] sm:$0xff] }
 0x2a9   : > { %2314 = vmatpush.xpose.msra.mxu3 %v2285_v10  ;;  %v4267_v10 = vld [vmem:[#allocation31_spill] sm:$0xff] }
 0x2aa   : > { %v2017_v1 = vadd.f32 %v2016_v49, %v4267_v10 }
 0x2ad   : > { %2315 = vmatpush.xpose.msra.mxu3 %v2282_v22 }
 0x2ae   : > { %v2148_v50 = vpop.f32.mrf.mxu2 }
 0x2af   : > { %v4035_v16 = vadd.f32 %v2148_v50, %v2100_v23  ;;  %v2058_v51 = vpop.f32.mrf.mxu0  ;;  %v2102_v5 = vpop.f32.mrf.mxu1 }
 0x2b0   : > { %v2059_v6 = vadd.f32 %v2058_v51, %v2010_v57  ;;  %v2103_v47 = vadd.f32 %v2102_v5, %v2054_v35  ;;  %v2219_v35 = vadd.f32 %v4012_v29, %v3982_v8  ;;  %v2213_v8 = vadd.f32 %v4012_v29, %v3965_v37  ;;  %v2019_v0 = vpop.f32.mrf.mxu3  ;;  %v4269_v5 = vld [vmem:[#allocation36_spill] sm:$0xff] }
 0x2b1   : > { %2316 = vmatpush.xpose.msra.mxu3 %v2279_v18  ;;  %v2207_v37 = vadd.f32 %v4012_v29, %v3948_v26  ;;  %v2020_v22 = vadd.f32 %v2019_v0, %v4268_v9  ;;  %v2201_v51 = vadd.f32 %v4012_v29, %v3925_v62  ;;  %v2195_v62 = vadd.f32 %v4012_v29, %v3899_v61  ;;  %v4270_v9 = vld [vmem:[#allocation49_spill] sm:$0xff] }
 0x2b2   : > { %v2267_v19 = vmax.f32 %v2219_v35, 0.0  ;;  %v2261_v59 = vmax.f32 %v2213_v8, 0.0 }
 0x2b3   : > { %v2255_v21 = vmax.f32 %v2207_v37, 0.0 }
 0x2b5   : > { %2317 = vmatpush.xpose.msra.mxu3 %v2276_v15  ;;  %v2249_v15 = vmax.f32 %v2201_v51, 0.0 }
 0x2b6   : > { %v2151_v12 = vpop.f32.mrf.mxu2 }
 0x2b7   : > { %v4041_v13 = vadd.f32 %v2151_v12, %v2103_v47  ;;  %v2060_v30 = vpop.f32.mrf.mxu0  ;;  %v2104_v41 = vpop.f32.mrf.mxu1 }
 0x2b8   : > { %v2061_v56 = vadd.f32 %v2060_v30, %v2012_v11  ;;  %v2105_v34 = vadd.f32 %v2104_v41, %v2056_v55  ;;  %v2021_v26 = vpop.f32.mrf.mxu3 }
 0x2b9   : > { %2318 = vmatpush.xpose.msra.mxu3 %v2273_v63  ;;  %v2022_v47 = vadd.f32 %v2021_v26, %v4269_v5  ;;  %v2246_v63 = vmax.f32 %v2198_v43, 0.0  ;;  %v4083_v5 = vperm.slane %v3876_v32, 2 }
 0x2bd   : > { %2319 = vmatpush.xpose.msra.mxu3 %v2270_v2 }
 0x2be   : > { %v2153_v14 = vpop.f32.mrf.mxu2 }
 0x2bf   : > { %v4048_v45 = vadd.f32 %v2153_v14, %v2105_v34  ;;  %v2063_v28 = vpop.f32.mrf.mxu0  ;;  %v2107_v39 = vpop.f32.mrf.mxu1 }
 0x2c0   : > { %v2064_v40 = vadd.f32 %v2063_v28, %v2015_v38  ;;  %v2108_v58 = vadd.f32 %v2107_v39, %v2059_v6  ;;  %v2252_v6 = vmax.f32 %v2204_v52, 0.0  ;;  %v2024_v3 = vpop.f32.mrf.mxu3 }
 0x2c1   : > { %2320 = vmatpush.xpose.msra.mxu3 %v2267_v19 }
 0x2c5   : > { %2321 = vmatpush.xpose.msra.mxu3 %v2264_v53 }
 0x2c6   : > { %v2156_v55 = vpop.f32.mrf.mxu2 }
 0x2c7   : > { %v4055_v7 = vadd.f32 %v2156_v55, %v2108_v58  ;;  %v2065_v36 = vpop.f32.mrf.mxu0  ;;  %v2109_v23 = vpop.f32.mrf.mxu1 }
 0x2c8   : > { %v2066_v44 = vadd.f32 %v2065_v36, %v2017_v1  ;;  %v2110_v42 = vadd.f32 %v2109_v23, %v2061_v56  ;;  %v2243_v56 = vmax.f32 %v2195_v62, 0.0  ;;  %v2026_v19 = vpop.f32.mrf.mxu3 }
 0x2c9   : > { %2322 = vmatpush.xpose.msra.mxu3 %v2261_v59 }
 0x2cd   : > { %2323 = vmatpush.xpose.msra.mxu3 %v2258_v33 }
 0x2ce   : > { %v2158_v27 = vpop.f32.mrf.mxu2 }
 0x2cf   : > { %v4062_v57 = vadd.f32 %v2158_v27, %v2110_v42  ;;  %v2068_v50 = vpop.f32.mrf.mxu0  ;;  %v2112_v4 = vpop.f32.mrf.mxu1  ;;  %v4271_v27 = vld [vmem:[#allocation51_spill] sm:$0xff] }
 0x2d0   : > { %v2069_v54 = vadd.f32 %v2068_v50, %v2020_v22  ;;  %v2113_v18 = vadd.f32 %v2112_v4, %v2064_v40  ;;  %v2029_v39 = vpop.f32.mrf.mxu3  ;;  %v4272_v4 = vld [vmem:[#allocation46_spill] sm:$0xff] }
 0x2d1   : > { %2324 = vmatpush.xpose.msra.mxu3 %v2255_v21 }
 0x2d5   : > { %2325 = vmatpush.xpose.msra.mxu3 %v2252_v6 }
 0x2d6   : > { %v2161_v48 = vpop.f32.mrf.mxu2 }
 0x2d7   : > { %v4069_v17 = vadd.f32 %v2161_v48, %v2113_v18  ;;  %v2070_v25 = vpop.f32.mrf.mxu0  ;;  %v2114_v12 = vpop.f32.mrf.mxu1 }
 0x2d8   : > { %v2071_v11 = vadd.f32 %v2070_v25, %v2022_v47  ;;  %v2115_v46 = vadd.f32 %v2114_v12, %v2066_v44  ;;  %v2031_v1 = vpop.f32.mrf.mxu3 }
 0x2d9   : > { %2326 = vmatpush.xpose.msra.mxu3 %v2249_v15  ;;  %v2032_v18 = vadd.f32 %v2031_v1, %v4272_v4  ;;  %v4273_v15 = vld [vmem:[#allocation44_spill] sm:$0xff] }
 0x2da   : > { %v2030_v25 = vadd.f32 %v2029_v39, %v4273_v15 }
 0x2dd   : > { %2327 = vmatpush.xpose.msra.mxu3 %v2246_v63 }
 0x2de   : > { %v2163_v30 = vpop.f32.mrf.mxu2 }
 0x2df   : > { %v4073_v41 = vadd.f32 %v2163_v30, %v2115_v46  ;;  %v2117_v34 = vpop.f32.mrf.mxu1  ;;  %v2073_v2 = vpop.f32.mrf.mxu0 }
 0x2e0   : > { %v2118_v35 = vadd.f32 %v2117_v34, %v2069_v54  ;;  %v2034_v36 = vpop.f32.mrf.mxu3 }
 0x2e1   : > { %2328 = vmatpush.xpose.msra.mxu3 %v2243_v56  ;;  %v2035_v22 = vadd.f32 %v2034_v36, %v4270_v9  ;;  %v4274_v56 = vld [vmem:[#allocation41_spill] sm:$0xff] }
 0x2e2   : > { %v2027_v34 = vadd.f32 %v2026_v19, %v4274_v56  ;;  %v2290_v19 = vld [vmem:[%s4162_s7] sm:$0xff] }
 0x2e3   : > { %2309 = vmatmul.f32.vlgmr.msrb.gmra.mxu3 %v2290_v19 }
 0x2e6   : > { %v2166_v60 = vpop.f32.mrf.mxu2 }
 0x2e7   : > { %v4075_v38 = vadd.f32 %v2166_v60, %v2118_v35  ;;  %v2119_v14 = vpop.f32.mrf.mxu1  ;;  %v2075_v61 = vpop.f32.mrf.mxu0 }
 0x2e8   : > { %v2120_v24 = vadd.f32 %v2119_v14, %v2071_v11  ;;  %v2036_v42 = vpop.f32.mrf.mxu3  ;;  %v2076_v60 = vadd.f32 %v2075_v61, %v2027_v34 }
 0x2e9   : > { %v2037_v52 = vadd.f32 %v2036_v42, %v4271_v27 }
 0x2ee   : > { %v2168_v49 = vpop.f32.mrf.mxu2 }
 0x2ef   : > { %v4077_v28 = vadd.f32 %v2168_v49, %v2120_v24  ;;  %v2122_v29 = vpop.f32.mrf.mxu1  ;;  %v2078_v8 = vpop.f32.mrf.mxu0  ;;  %v4275_v49 = vld [vmem:[#allocation39_spill] sm:$0xff] }
 0x2f0   : > { %v2079_v46 = vadd.f32 %v2078_v8, %v2030_v25  ;;  %v2025_v1 = vadd.f32 %v2024_v3, %v4275_v49 }
 0x2f6   : > { %v2171_v40 = vpop.f32.mrf.mxu2 }
 0x2f7   : > { %v2124_v58 = vpop.f32.mrf.mxu1  ;;  %v2080_v55 = vpop.f32.mrf.mxu0 }
 0x2f8   : > { %v2081_v47 = vadd.f32 %v2080_v55, %v2032_v18  ;;  %v2125_v39 = vadd.f32 %v2124_v58, %v2076_v60  ;;  %v2074_v55 = vadd.f32 %v2073_v2, %v2025_v1  ;;  %v2291_v2 = vld [vmem:[%s4162_s7 + $0x8] sm:$0xff]  ;;  %v2354_v18 = vstv %s2353_s27 }
 0x2f9   : > { %2329 = vmatmul.f32.vlgmr.msra.gmra.mxu3 %v2291_v2 }
 0x2fe   : > { %v2173_v53 = vpop.f32.mrf.mxu2 }
 0x2ff   : > { %v2127_v10 = vpop.f32.mrf.mxu1  ;;  %v2083_v44 = vpop.f32.mrf.mxu0 }
 0x300   : > { %v2084_v50 = vadd.f32 %v2083_v44, %v2035_v22  ;;  %v2128_v35 = vadd.f32 %v2127_v10, %v2079_v46  ;;  %v2123_v10 = vadd.f32 %v2122_v29, %v2074_v55  ;;  %v2220_v29 = vadd.f32 %v4083_v5, %v4075_v38 }
 0x301   : > { %v2208_v38 = vadd.f32 %v4083_v5, %v4055_v7  ;;  %v2196_v7 = vadd.f32 %v4083_v5, %v4023_v31 }
 0x302   : > { %v2172_v61 = vadd.f32 %v2171_v40, %v2123_v10  ;;  %v2268_v42 = vmax.f32 %v2220_v29, 0.0 }
 0x303   : > { %v2256_v27 = vmax.f32 %v2208_v38, 0.0 }
 0x304   : > { %v2226_v3 = vadd.f32 %v4083_v5, %v2172_v61 }
 0x306   : > { %v2176_v20 = vpop.f32.mrf.mxu2 }
 0x307   : > { %v2129_v59 = vpop.f32.mrf.mxu1  ;;  %v2085_v33 = vpop.f32.mrf.mxu0  ;;  %v2177_v32 = vadd.f32 %v2176_v20, %v2128_v35 }
 0x308   : > { %v2086_v54 = vadd.f32 %v2085_v33, %v2037_v52  ;;  %v2130_v11 = vadd.f32 %v2129_v59, %v2081_v47  ;;  %v2174_v59 = vadd.f32 %v2173_v53, %v2125_v39  ;;  %v2223_v53 = vadd.f32 %v4083_v5, %v4077_v28 }
 0x309   : > { %v2232_v8 = vadd.f32 %v4083_v5, %v2177_v32  ;;  %v2211_v28 = vadd.f32 %v4083_v5, %v4062_v57  ;;  %v2199_v57 = vadd.f32 %v4083_v5, %v4035_v16 }
 0x30a   : > { %v2229_v20 = vadd.f32 %v4083_v5, %v2174_v59  ;;  %v2271_v40 = vmax.f32 %v2223_v53, 0.0 }
 0x30b   : > { %v2280_v44 = vmax.f32 %v2232_v8, 0.0  ;;  %v2259_v22 = vmax.f32 %v2211_v28, 0.0 }
 0x30c   : > { %v2277_v58 = vmax.f32 %v2229_v20, 0.0 }
 0x30e   : > { %v2178_v23 = vpop.f32.mrf.mxu2 }
 0x30f   : > { %v2132_v0 = vpop.f32.mrf.mxu1  ;;  %v2179_v62 = vadd.f32 %v2178_v23, %v2130_v11  ;;  %v2274_v23 = vmax.f32 %v2226_v3, 0.0 }
 0x310   : > { %v2133_v51 = vadd.f32 %v2132_v0, %v2084_v50  ;;  %v2217_v0 = vadd.f32 %v4083_v5, %v4073_v41  ;;  %v2205_v41 = vadd.f32 %v4083_v5, %v4048_v45  ;;  %v2247_v50 = vmax.f32 %v2199_v57, 0.0 }
 0x311   : > { %v2235_v14 = vadd.f32 %v4083_v5, %v2179_v62  ;;  %v2244_v45 = vmax.f32 %v2196_v7, 0.0 }
 0x312   : > { %v2265_v33 = vmax.f32 %v2217_v0, 0.0  ;;  %v2253_v52 = vmax.f32 %v2205_v41, 0.0 }
 0x313   : > { %v2283_v36 = vmax.f32 %v2235_v14, 0.0 }
 0x316   : > { %v2181_v37 = vpop.f32.mrf.mxu2 }
 0x317   : > { %v2134_v21 = vpop.f32.mrf.mxu1  ;;  %v2182_v48 = vadd.f32 %v2181_v37, %v2133_v51  ;;  %v2214_v37 = vadd.f32 %v4083_v5, %v4069_v17  ;;  %v2202_v17 = vadd.f32 %v4083_v5, %v4041_v13 }
 0x318   : > { %v2135_v26 = vadd.f32 %v2134_v21, %v2086_v54  ;;  %v2292_v54 = vld [vmem:[%s4162_s7 + $0x10] sm:$0xff] }
 0x319   : > { %v2238_v63 = vadd.f32 %v4083_v5, %v2182_v48  ;;  %v2262_v9 = vmax.f32 %v2214_v37, 0.0  ;;  %v2250_v21 = vmax.f32 %v2202_v17, 0.0 }
 0x31b   : > { %v2286_v24 = vmax.f32 %v2238_v63, 0.0 }
 0x31e   : > { %v2183_v6 = vpop.f32.mrf.mxu2 }
 0x31f   : > { %v2184_v43 = vadd.f32 %v2183_v6, %v2135_v26 }
 0x321   : > { %v2241_v12 = vadd.f32 %v4083_v5, %v2184_v43 }
 0x323   : > { %v2289_v30 = vmax.f32 %v2241_v12, 0.0 }
 0x325   : > { %2333 = vmatpush.xpose.msrb.mxu0 %v2289_v30 }
 0x329   : > { %2334 = vmatpush.xpose.msrb.mxu0 %v2286_v24 }
 0x32d   : > { %2335 = vmatpush.xpose.msrb.mxu0 %v2283_v36 }
 0x331   : > { %2336 = vmatpush.xpose.msrb.mxu0 %v2280_v44 }
 0x335   : > { %2337 = vmatpush.xpose.msrb.mxu0 %v2277_v58 }
 0x339   : > { %2338 = vmatpush.xpose.msrb.mxu0 %v2274_v23 }
 0x33d   : > { %2339 = vmatpush.xpose.msrb.mxu0 %v2271_v40 }
 0x341   : > { %2340 = vmatpush.xpose.msrb.mxu0 %v2268_v42 }
 0x345   : > { %2341 = vmatpush.xpose.msrb.mxu0 %v2265_v33 }
 0x349   : > { %2342 = vmatpush.xpose.msrb.mxu0 %v2262_v9 }
 0x34d   : > { %2343 = vmatpush.xpose.msrb.mxu0 %v2259_v22 }
 0x351   : > { %2344 = vmatpush.xpose.msrb.mxu0 %v2256_v27 }
 0x355   : > { %2345 = vmatpush.xpose.msrb.mxu0 %v2253_v52 }
 0x359   : > { %2346 = vmatpush.xpose.msrb.mxu0 %v2250_v21 }
 0x35d   : > { %2347 = vmatpush.xpose.msrb.mxu0 %v2247_v50 }
 0x361   : > { %2348 = vmatpush.xpose.msrb.mxu0 %v2244_v45 }
 0x364   : > { %2349 = vmatmul.f32.vlgmr.msrb.gmra.mxu0 %v2292_v54 }
 0x366   : > { %v2310_v13 = vpop.f32.mrf.mxu3 }
 0x37c   : > { %v2330_v4 = vpop.f32.mrf.mxu3 }
 0x37d   : > { %v2331_v16 = vadd.f32 %v2330_v4, %v2310_v13 }
 0x3e1   : > { %v2350_v31 = vpop.f32.mrf.mxu0 }
 0x3e2   : > { %v2351_v51 = vadd.f32 %v2350_v31, %v2331_v16 }
 0x3e4   : > { %v2355_v26 = vadd.f32 %v2354_v18, %v2351_v51 }
 0x3e6   : > { %2356 = vst [vmem:[%s359_s15] sm:$0x1] %v2355_v26 }
 0x3e7   : > { %3107 = shalt.err (!%p3104_p8)
}
 0x3e8   : > { %3002 = dma.vmem_to_hbm [thread:$0]  (%p3242_p5), %s2369_s17, 16, %s2371_s18, %s2358_s22  }
 0x3e9 PF: > { %p3014_p9 = scmp.ge.s32.totalorder %s3146_s14, 2  ;;  %s2382_s28 = sand.u32 1, %s3134_s11  }
 0x3ea   : > { %s2383_s29 = scalar_lea.sflag [#allocation5], %s2382_s28 }
 0x3eb   : > { %p3009_p10 = pnand %p3014_p9, %p3246_p6 }
 0x3ed   : > { %p3010_p11 = pneg %p3009_p10 }
 0x3ef   : > { %3129 = dma.done.wait (%p3010_p11), %s2383_s29, 16  }
 0x3f0   : > { %3131 = vsyncadd (%p3010_p11), %s2383_s29, 4294967280  ;;  %p21_p12 = scmp.ge.s32.totalorder %s3229_s16, 4   ;;  %s4276_s11 = smov %s3138_s12 }
 0x3f1   : > { %s4277_s12 = smov %s3142_s13  ;;  %s4278_s13 = smov %s3240_s19 }
 0x3f2   : > { %s4279_s14 = smov %s3229_s16  ;;  %23 = sbr.rel (!%p21_p12) target bundleno = 6 (0x6), region = 99 }
 0x3f7   :  { %2388 = vsyncpa [#allocation4], 1 }
 0x3f8   :  { %2390 = vsyncpa [#allocation4 + $0x1], 1 }
 0x3f9   :  { %2391 = vsyncpa [#allocation5], 1 }
 0x3fa   :  { %2393 = vsyncpa [#allocation5 + $0x1], 1 }

</bundles_post_ra>
